<compile_context>
chip_gen: v6e
topology: v6e:2x2x1
jax: 0.10.0
libtpu: 0.0.40
codegen_flags: <defaults>
</compile_context>

<pallas_src>
import functools

import jax
import jax.numpy as jnp
from jax.experimental import pallas as pl
from jax.experimental.pallas import tpu as pltpu


def _round_up(x, m):
    return ((x + m - 1) // m) * m


def window_atten_kernel(x_ref, w_ref, b_ref, o_ref, *, ws, H, W):
    """A block of whole images: fused QKV projection + per-window attention.

    x_ref : (nb, C, H*W)  images, channel-major (native NCHW, spatial flattened)
    w_ref : (3C, C)       fused [wq * C**-0.5 ; wk ; wv] 1x1-conv weights
    b_ref : (3C, 1)       fused [bq * C**-0.5 ; bk ; bv] biases (f32)
    o_ref : (nb, C, H*W)
    """
    nb, C, _ = x_ref.shape
    nH, nW = H // ws, W // ws

    # Weights/biases are tiny (3C x C); double-buffering them is negligible.
    # For large C, mark these specs with pipeline_mode=pl.Buffered(1) instead.
    w = w_ref[...]                              # native dtype -> MXU
    b = b_ref[...].astype(jnp.float32)          # (3C, 1)

    for ib in range(nb):
        # Fused q|k|v projection: ONE channel matmul over all tokens of the
        # image (lane axis = H*W), f32 accumulation on the MXU.
        qkv = jnp.dot(w, x_ref[ib], preferred_element_type=jnp.float32) + b  # (3C, HW)

        for wi in range(nH):
            for wj in range(nW):
                # Gather the ws*ws window tokens (channel-major): ws contiguous
                # lane slices of the flattened spatial axis.
                base = (wi * ws) * W + wj * ws
                rows = [qkv[:, base + r * W: base + r * W + ws] for r in range(ws)]
                qkv_w = jnp.concatenate(rows, axis=1)            # (3C, T)

                q = qkv_w[0:C, :]                                # (C, T), pre-scaled
                k = qkv_w[C:2 * C, :]
                v = qkv_w[2 * C:3 * C, :]

                # Single-head scaled dot-product attention inside the window.
                s = jnp.dot(q.T, k, preferred_element_type=jnp.float32)      # (T, T)
                s = s - jnp.max(s, axis=-1, keepdims=True)
                p = jnp.exp(s)
                p = p * pl.reciprocal(jnp.sum(p, axis=-1, keepdims=True), approx=True)
                o_w = jnp.dot(v, p.T, preferred_element_type=jnp.float32)    # (C, T)

                # Scatter back into the image's flattened spatial layout.
                for r in range(ws):
                    dst = base + r * W
                    o_ref[ib, :, dst:dst + ws] = (
                        o_w[:, r * ws:(r + 1) * ws].astype(o_ref.dtype))


def _pick_images_per_block(B, C, HW, itemsize, vmem_budget_bytes=24 * 1024 * 1024):
    """Images per grid step.

    Budgets PADDED VMEM bytes of the double-buffered in/out tiles plus the f32
    fused-qkv intermediate (not just logical in+out bytes).  Keeps >= 2 grid
    steps (preferring an even count) when B allows it so both v7x TensorCores
    get work on the 'parallel' image axis; on single-TC v5e/v6e the extra step
    costs only ~0.35us.
    """
    pad_hw = _round_up(HW, 128)
    pad_c = _round_up(max(C, 8), 8)
    io_bytes = 2 * 2 * pad_c * pad_hw * itemsize        # x + out, double-buffered
    qkv_bytes = _round_up(3 * C, 8) * pad_hw * 4        # f32 fused projection
    per_image = io_bytes + qkv_bytes
    cap = max(1, vmem_budget_bytes // per_image)
    if B >= 2:
        cap = min(cap, B // 2)
    candidates = [d for d in range(1, B + 1) if B % d == 0 and d <= cap]
    # Prefer an even number of grid steps, then the largest block.
    return max(candidates, key=lambda d: (((B // d) % 2 == 0), d))


def window_atten(x, wq, bq, wk, bk, wv, bv, window_size=7):
    """x: (B, C, H, W) NCHW; wX: (C_out, C_in) squeezed 1x1-conv weights; bX: (C,)."""
    B, C, H, W = x.shape
    ws = window_size
    # TODO(synk): no padding / cyclic shift for H, W not divisible by window_size.
    assert H % ws == 0 and W % ws == 0, "H, W must be multiples of the window size"
    HW = H * W
    T = ws * ws
    n_windows = B * (H // ws) * (W // ws)

    # Free, transpose-less layout: NCHW with the spatial axes flattened
    # (lane-dense last dim = H*W instead of C).
    x_flat = x.reshape(B, C, HW)

    # Fuse the three 1x1 convs into one (3C, C) weight / (3C, 1) bias; fold the
    # 1/sqrt(C) attention scale into BOTH the q weight and q bias.
    scale = float(C) ** -0.5
    w_qkv = jnp.concatenate([wq * scale, wk, wv], axis=0).astype(x.dtype)   # (3C, C)
    b_qkv = jnp.concatenate([bq * scale, bk, bv], axis=0).reshape(3 * C, 1)
    b_qkv = b_qkv.astype(jnp.float32)

    nb = _pick_images_per_block(B, C, HW, x.dtype.itemsize)
    grid = (B // nb,)

    kernel = functools.partial(window_atten_kernel, ws=ws, H=H, W=W)

    flops = B * (2 * 3 * C * C * HW) + n_windows * (2 * 2 * T * T * C)
    bytes_accessed = 2 * B * C * HW * x.dtype.itemsize + (3 * C * C + 3 * C) * 4

    out_flat = pl.pallas_call(
        kernel,
        out_shape=jax.ShapeDtypeStruct((B, C, HW), x.dtype),
        grid_spec=pltpu.PrefetchScalarGridSpec(
            num_scalar_prefetch=0,
            grid=grid,
            in_specs=[
                pl.BlockSpec((nb, C, HW), lambda i: (i, 0, 0)),   # images
                pl.BlockSpec((3 * C, C), lambda i: (0, 0)),       # fused w_qkv
                pl.BlockSpec((3 * C, 1), lambda i: (0, 0)),       # fused b_qkv
            ],
            out_specs=pl.BlockSpec((nb, C, HW), lambda i: (i, 0, 0)),
        ),
        compiler_params=pltpu.CompilerParams(
            dimension_semantics=("parallel",),
            vmem_limit_bytes=32 * 1024 * 1024),
        cost_estimate=pl.CostEstimate(
            flops=int(flops),
            transcendentals=int(n_windows * T * T),
            bytes_accessed=int(bytes_accessed)),
    )(x_flat, w_qkv, b_qkv)

    return out_flat.reshape(B, C, H, W)


# ----------------------------- pure-JAX reference -----------------------------

def _window_partition(x, ws):
    """(B, C, H, W) -> (B * nH * nW, ws*ws, C)."""
    B, C, H, W = x.shape
    x = x.reshape(B, C, H // ws, ws, W // ws, ws)
    x = x.transpose(0, 2, 4, 3, 5, 1)                # (B, nH, nW, ws, ws, C)
    return x.reshape(B * (H // ws) * (W // ws), ws * ws, C)


def _window_reverse(xw, ws, B, C, H, W):
    """(B * nH * nW, ws*ws, C) -> (B, C, H, W)."""
    x = xw.reshape(B, H // ws, W // ws, ws, ws, C)
    x = x.transpose(0, 5, 1, 3, 2, 4)                # (B, C, nH, ws, nW, ws)
    return x.reshape(B, C, H, W)


def window_atten_ref(x, wq, bq, wk, bk, wv, bv, window_size=7):
    """Pure-JAX reference mirroring the PyTorch forward."""
    B, C, H, W = x.shape
    hp = jax.lax.Precision.HIGHEST
    xf = x.astype(jnp.float32)

    def conv1x1(w, b):
        y = jnp.einsum("oc,bchw->bohw", w.astype(jnp.float32), xf, precision=hp)
        return y + b.astype(jnp.float32)[None, :, None, None]

    q = conv1x1(wq, bq)
    k = conv1x1(wk, bk)
    v = conv1x1(wv, bv)

    qw = _window_partition(q, window_size)
    kw = _window_partition(k, window_size)
    vw = _window_partition(v, window_size)

    scale = float(C) ** -0.5
    attn = jnp.einsum("wqc,wkc->wqk", qw * scale, kw, precision=hp)
    attn = jax.nn.softmax(attn, axis=-1)
    ow = jnp.einsum("wqk,wkc->wqc", attn, vw, precision=hp)
    return _window_reverse(ow, window_size, B, C, H, W).astype(x.dtype)


if __name__ == "__main__":
    B, C, H, W = 2, 8, 14, 14          # 2x2 grid of 7x7 windows per image
    ws = 7

    key = jax.random.PRNGKey(0)
    kx, kq, kbq, kk, kbk, kv, kbv = jax.random.split(key, 7)

    x = jax.random.normal(kx, (B, C, H, W), dtype=jnp.float32)
    # nn.Conv2d(C, C, 1) parameters, with the 1x1 taps squeezed: (C_out, C_in).
    wq = jax.random.normal(kq, (C, C), dtype=jnp.float32) * 0.3
    bq = jax.random.normal(kbq, (C,), dtype=jnp.float32) * 0.1
    wk = jax.random.normal(kk, (C, C), dtype=jnp.float32) * 0.3
    bk = jax.random.normal(kbk, (C,), dtype=jnp.float32) * 0.1
    wv = jax.random.normal(kv, (C, C), dtype=jnp.float32) * 0.3
    bv = jax.random.normal(kbv, (C,), dtype=jnp.float32) * 0.1

    out = window_atten(x, wq, bq, wk, bk, wv, bv, window_size=ws)
    out = jax.block_until_ready(out)

    ref = window_atten_ref(x, wq, bq, wk, bk, wv, bv, window_size=ws)
    assert out.shape == (B, C, H, W)
    # Slightly looser tolerance: approx (EUP) reciprocal in the softmax denom.
    assert jnp.allclose(out, ref, atol=2e-3, rtol=2e-3), "mismatch vs reference"

    print("KERNEL_OK")
</pallas_src>

<mosaic_0001>
module attributes {stable_mosaic.version = 11 : i64} {
  func.func @window_atten_kernel(%arg0: i32, %arg1: memref<1x8x196xf32, #tpu.memory_space<vmem>>, %arg2: memref<24x8xf32, #tpu.memory_space<vmem>>, %arg3: memref<24x1xf32, #tpu.memory_space<vmem>>, %arg4: memref<1x8x196xf32, #tpu.memory_space<vmem>>) attributes {dimension_semantics = [#tpu.dimension_semantics<parallel>], iteration_bounds = array<i64: 2>, scalar_prefetch = 0 : i64, scratch_operands = 0 : i64, tpu.core_type = #tpu.core_type<tc>, window_params = [{transform_indices = @transform_0, window_bounds = array<i64: 1, 8, 196>}, {pipeline_mode = #tpu.pipeline_mode<synchronous>, transform_indices = @transform_1, window_bounds = array<i64: 24, 8>}, {pipeline_mode = #tpu.pipeline_mode<synchronous>, transform_indices = @transform_2, window_bounds = array<i64: 24, 1>}, {transform_indices = @transform_3, window_bounds = array<i64: 1, 8, 196>}]} {
    %c0 = arith.constant 0 : index
    %c0_0 = arith.constant 0 : index
    %0 = vector.load %arg2[%c0, %c0_0] : memref<24x8xf32, #tpu.memory_space<vmem>>, vector<24x8xf32>
    %c0_1 = arith.constant 0 : index
    %c0_2 = arith.constant 0 : index
    %1 = vector.load %arg3[%c0_1, %c0_2] : memref<24x1xf32, #tpu.memory_space<vmem>>, vector<24x1xf32>
    %c0_3 = arith.constant 0 : index
    %c0_4 = arith.constant 0 : index
    %c0_5 = arith.constant 0 : index
    %2 = vector.load %arg1[%c0_3, %c0_4, %c0_5] : memref<1x8x196xf32, #tpu.memory_space<vmem>>, vector<1x8x196xf32>
    %3 = vector.shape_cast %2 : vector<1x8x196xf32> to vector<8x196xf32>
    %cst = arith.constant dense<0.000000e+00> : vector<24x196xf32>
    %4 = tpu.matmul %0, %3, %cst {dimension_numbers = #tpu.dot_dimension_numbers<[1], [0], [0], [1], [0, 0, 1, 1], [], []>} : vector<24x8xf32>, vector<8x196xf32>, vector<24x196xf32> -> vector<24x196xf32>
    %5 = vector.broadcast %1 : vector<24x1xf32> to vector<24x196xf32>
    %6 = arith.addf %4, %5 : vector<24x196xf32>
    %7 = vector.extract_strided_slice %6 {offsets = [0, 0], sizes = [24, 7], strides = [1, 1]} : vector<24x196xf32> to vector<24x7xf32>
    %8 = vector.extract_strided_slice %6 {offsets = [0, 14], sizes = [24, 7], strides = [1, 1]} : vector<24x196xf32> to vector<24x7xf32>
    %9 = vector.extract_strided_slice %6 {offsets = [0, 28], sizes = [24, 7], strides = [1, 1]} : vector<24x196xf32> to vector<24x7xf32>
    %10 = vector.extract_strided_slice %6 {offsets = [0, 42], sizes = [24, 7], strides = [1, 1]} : vector<24x196xf32> to vector<24x7xf32>
    %11 = vector.extract_strided_slice %6 {offsets = [0, 56], sizes = [24, 7], strides = [1, 1]} : vector<24x196xf32> to vector<24x7xf32>
    %12 = vector.extract_strided_slice %6 {offsets = [0, 70], sizes = [24, 7], strides = [1, 1]} : vector<24x196xf32> to vector<24x7xf32>
    %13 = vector.extract_strided_slice %6 {offsets = [0, 84], sizes = [24, 7], strides = [1, 1]} : vector<24x196xf32> to vector<24x7xf32>
    %14 = tpu.concatenate %7, %8, %9, %10, %11, %12, %13 in 1 : vector<24x7xf32>, vector<24x7xf32>, vector<24x7xf32>, vector<24x7xf32>, vector<24x7xf32>, vector<24x7xf32>, vector<24x7xf32> -> vector<24x49xf32>
    %15 = vector.extract_strided_slice %14 {offsets = [0, 0], sizes = [8, 49], strides = [1, 1]} : vector<24x49xf32> to vector<8x49xf32>
    %16 = vector.extract_strided_slice %14 {offsets = [8, 0], sizes = [8, 49], strides = [1, 1]} : vector<24x49xf32> to vector<8x49xf32>
    %17 = vector.extract_strided_slice %14 {offsets = [16, 0], sizes = [8, 49], strides = [1, 1]} : vector<24x49xf32> to vector<8x49xf32>
    %18 = tpu.transpose %15, [1, 0] : vector<8x49xf32> -> vector<49x8xf32>
    %cst_6 = arith.constant dense<0.000000e+00> : vector<49x49xf32>
    %19 = tpu.matmul %18, %16, %cst_6 {dimension_numbers = #tpu.dot_dimension_numbers<[1], [0], [0], [1], [0, 0, 1, 1], [], []>} : vector<49x8xf32>, vector<8x49xf32>, vector<49x49xf32> -> vector<49x49xf32>
    %cst_7 = arith.constant dense<0xFF800000> : vector<49xf32>
    %20 = vector.multi_reduction <maximumf>, %19, %cst_7 [1] : vector<49x49xf32> to vector<49xf32>
    %21 = vector.shape_cast %20 : vector<49xf32> to vector<49x1xf32>
    %22 = vector.broadcast %21 : vector<49x1xf32> to vector<49x49xf32>
    %23 = arith.subf %19, %22 : vector<49x49xf32>
    %24 = math.exp %23 : vector<49x49xf32>
    %cst_8 = arith.constant dense<0.000000e+00> : vector<49xf32>
    %25 = vector.multi_reduction <add>, %24, %cst_8 [1] : vector<49x49xf32> to vector<49xf32>
    %26 = vector.shape_cast %25 : vector<49xf32> to vector<49x1xf32>
    %27 = tpu.reciprocal %26 {approx = true} : vector<49x1xf32> -> vector<49x1xf32>
    %28 = vector.broadcast %27 : vector<49x1xf32> to vector<49x49xf32>
    %29 = arith.mulf %24, %28 : vector<49x49xf32>
    %30 = tpu.transpose %29, [1, 0] : vector<49x49xf32> -> vector<49x49xf32>
    %cst_9 = arith.constant dense<0.000000e+00> : vector<8x49xf32>
    %31 = tpu.matmul %17, %30, %cst_9 {dimension_numbers = #tpu.dot_dimension_numbers<[1], [0], [0], [1], [0, 0, 1, 1], [], []>} : vector<8x49xf32>, vector<49x49xf32>, vector<8x49xf32> -> vector<8x49xf32>
    %32 = vector.extract_strided_slice %31 {offsets = [0, 0], sizes = [8, 7], strides = [1, 1]} : vector<8x49xf32> to vector<8x7xf32>
    %c0_10 = arith.constant 0 : index
    %c0_11 = arith.constant 0 : index
    %c0_12 = arith.constant 0 : index
    %33 = vector.load %arg4[%c0_10, %c0_11, %c0_12] : memref<1x8x196xf32, #tpu.memory_space<vmem>>, vector<1x8x7xf32>
    %34 = vector.shape_cast %33 : vector<1x8x7xf32> to vector<8x7xf32>
    %35 = vector.shape_cast %32 : vector<8x7xf32> to vector<1x8x7xf32>
    tpu.vector_store %arg4[%c0_10, %c0_11, %c0_12], %35 {strides = array<i32>} : memref<1x8x196xf32, #tpu.memory_space<vmem>>, vector<1x8x7xf32>,
    %36 = vector.extract_strided_slice %31 {offsets = [0, 7], sizes = [8, 7], strides = [1, 1]} : vector<8x49xf32> to vector<8x7xf32>
    %c0_13 = arith.constant 0 : index
    %c0_14 = arith.constant 0 : index
    %c14 = arith.constant 14 : index
    %37 = vector.load %arg4[%c0_13, %c0_14, %c14] : memref<1x8x196xf32, #tpu.memory_space<vmem>>, vector<1x8x7xf32>
    %38 = vector.shape_cast %37 : vector<1x8x7xf32> to vector<8x7xf32>
    %39 = vector.shape_cast %36 : vector<8x7xf32> to vector<1x8x7xf32>
    tpu.vector_store %arg4[%c0_13, %c0_14, %c14], %39 {strides = array<i32>} : memref<1x8x196xf32, #tpu.memory_space<vmem>>, vector<1x8x7xf32>,
    %40 = vector.extract_strided_slice %31 {offsets = [0, 14], sizes = [8, 7], strides = [1, 1]} : vector<8x49xf32> to vector<8x7xf32>
    %c0_15 = arith.constant 0 : index
    %c0_16 = arith.constant 0 : index
    %c28 = arith.constant 28 : index
    %41 = vector.load %arg4[%c0_15, %c0_16, %c28] : memref<1x8x196xf32, #tpu.memory_space<vmem>>, vector<1x8x7xf32>
    %42 = vector.shape_cast %41 : vector<1x8x7xf32> to vector<8x7xf32>
    %43 = vector.shape_cast %40 : vector<8x7xf32> to vector<1x8x7xf32>
    tpu.vector_store %arg4[%c0_15, %c0_16, %c28], %43 {strides = array<i32>} : memref<1x8x196xf32, #tpu.memory_space<vmem>>, vector<1x8x7xf32>,
    %44 = vector.extract_strided_slice %31 {offsets = [0, 21], sizes = [8, 7], strides = [1, 1]} : vector<8x49xf32> to vector<8x7xf32>
    %c0_17 = arith.constant 0 : index
    %c0_18 = arith.constant 0 : index
    %c42 = arith.constant 42 : index
    %45 = vector.load %arg4[%c0_17, %c0_18, %c42] : memref<1x8x196xf32, #tpu.memory_space<vmem>>, vector<1x8x7xf32>
    %46 = vector.shape_cast %45 : vector<1x8x7xf32> to vector<8x7xf32>
    %47 = vector.shape_cast %44 : vector<8x7xf32> to vector<1x8x7xf32>
    tpu.vector_store %arg4[%c0_17, %c0_18, %c42], %47 {strides = array<i32>} : memref<1x8x196xf32, #tpu.memory_space<vmem>>, vector<1x8x7xf32>,
    %48 = vector.extract_strided_slice %31 {offsets = [0, 28], sizes = [8, 7], strides = [1, 1]} : vector<8x49xf32> to vector<8x7xf32>
    %c0_19 = arith.constant 0 : index
    %c0_20 = arith.constant 0 : index
    %c56 = arith.constant 56 : index
    %49 = vector.load %arg4[%c0_19, %c0_20, %c56] : memref<1x8x196xf32, #tpu.memory_space<vmem>>, vector<1x8x7xf32>
    %50 = vector.shape_cast %49 : vector<1x8x7xf32> to vector<8x7xf32>
    %51 = vector.shape_cast %48 : vector<8x7xf32> to vector<1x8x7xf32>
    tpu.vector_store %arg4[%c0_19, %c0_20, %c56], %51 {strides = array<i32>} : memref<1x8x196xf32, #tpu.memory_space<vmem>>, vector<1x8x7xf32>,
    %52 = vector.extract_strided_slice %31 {offsets = [0, 35], sizes = [8, 7], strides = [1, 1]} : vector<8x49xf32> to vector<8x7xf32>
    %c0_21 = arith.constant 0 : index
    %c0_22 = arith.constant 0 : index
    %c70 = arith.constant 70 : index
    %53 = vector.load %arg4[%c0_21, %c0_22, %c70] : memref<1x8x196xf32, #tpu.memory_space<vmem>>, vector<1x8x7xf32>
    %54 = vector.shape_cast %53 : vector<1x8x7xf32> to vector<8x7xf32>
    %55 = vector.shape_cast %52 : vector<8x7xf32> to vector<1x8x7xf32>
    tpu.vector_store %arg4[%c0_21, %c0_22, %c70], %55 {strides = array<i32>} : memref<1x8x196xf32, #tpu.memory_space<vmem>>, vector<1x8x7xf32>,
    %56 = vector.extract_strided_slice %31 {offsets = [0, 42], sizes = [8, 7], strides = [1, 1]} : vector<8x49xf32> to vector<8x7xf32>
    %c0_23 = arith.constant 0 : index
    %c0_24 = arith.constant 0 : index
    %c84 = arith.constant 84 : index
    %57 = vector.load %arg4[%c0_23, %c0_24, %c84] : memref<1x8x196xf32, #tpu.memory_space<vmem>>, vector<1x8x7xf32>
    %58 = vector.shape_cast %57 : vector<1x8x7xf32> to vector<8x7xf32>
    %59 = vector.shape_cast %56 : vector<8x7xf32> to vector<1x8x7xf32>
    tpu.vector_store %arg4[%c0_23, %c0_24, %c84], %59 {strides = array<i32>} : memref<1x8x196xf32, #tpu.memory_space<vmem>>, vector<1x8x7xf32>,
    %60 = vector.extract_strided_slice %6 {offsets = [0, 7], sizes = [24, 7], strides = [1, 1]} : vector<24x196xf32> to vector<24x7xf32>
    %61 = vector.extract_strided_slice %6 {offsets = [0, 21], sizes = [24, 7], strides = [1, 1]} : vector<24x196xf32> to vector<24x7xf32>
    %62 = vector.extract_strided_slice %6 {offsets = [0, 35], sizes = [24, 7], strides = [1, 1]} : vector<24x196xf32> to vector<24x7xf32>
    %63 = vector.extract_strided_slice %6 {offsets = [0, 49], sizes = [24, 7], strides = [1, 1]} : vector<24x196xf32> to vector<24x7xf32>
    %64 = vector.extract_strided_slice %6 {offsets = [0, 63], sizes = [24, 7], strides = [1, 1]} : vector<24x196xf32> to vector<24x7xf32>
    %65 = vector.extract_strided_slice %6 {offsets = [0, 77], sizes = [24, 7], strides = [1, 1]} : vector<24x196xf32> to vector<24x7xf32>
    %66 = vector.extract_strided_slice %6 {offsets = [0, 91], sizes = [24, 7], strides = [1, 1]} : vector<24x196xf32> to vector<24x7xf32>
    %67 = tpu.concatenate %60, %61, %62, %63, %64, %65, %66 in 1 : vector<24x7xf32>, vector<24x7xf32>, vector<24x7xf32>, vector<24x7xf32>, vector<24x7xf32>, vector<24x7xf32>, vector<24x7xf32> -> vector<24x49xf32>
    %68 = vector.extract_strided_slice %67 {offsets = [0, 0], sizes = [8, 49], strides = [1, 1]} : vector<24x49xf32> to vector<8x49xf32>
    %69 = vector.extract_strided_slice %67 {offsets = [8, 0], sizes = [8, 49], strides = [1, 1]} : vector<24x49xf32> to vector<8x49xf32>
    %70 = vector.extract_strided_slice %67 {offsets = [16, 0], sizes = [8, 49], strides = [1, 1]} : vector<24x49xf32> to vector<8x49xf32>
    %71 = tpu.transpose %68, [1, 0] : vector<8x49xf32> -> vector<49x8xf32>
    %cst_25 = arith.constant dense<0.000000e+00> : vector<49x49xf32>
    %72 = tpu.matmul %71, %69, %cst_25 {dimension_numbers = #tpu.dot_dimension_numbers<[1], [0], [0], [1], [0, 0, 1, 1], [], []>} : vector<49x8xf32>, vector<8x49xf32>, vector<49x49xf32> -> vector<49x49xf32>
    %cst_26 = arith.constant dense<0xFF800000> : vector<49xf32>
    %73 = vector.multi_reduction <maximumf>, %72, %cst_26 [1] : vector<49x49xf32> to vector<49xf32>
    %74 = vector.shape_cast %73 : vector<49xf32> to vector<49x1xf32>
    %75 = vector.broadcast %74 : vector<49x1xf32> to vector<49x49xf32>
    %76 = arith.subf %72, %75 : vector<49x49xf32>
    %77 = math.exp %76 : vector<49x49xf32>
    %cst_27 = arith.constant dense<0.000000e+00> : vector<49xf32>
    %78 = vector.multi_reduction <add>, %77, %cst_27 [1] : vector<49x49xf32> to vector<49xf32>
    %79 = vector.shape_cast %78 : vector<49xf32> to vector<49x1xf32>
    %80 = tpu.reciprocal %79 {approx = true} : vector<49x1xf32> -> vector<49x1xf32>
    %81 = vector.broadcast %80 : vector<49x1xf32> to vector<49x49xf32>
    %82 = arith.mulf %77, %81 : vector<49x49xf32>
    %83 = tpu.transpose %82, [1, 0] : vector<49x49xf32> -> vector<49x49xf32>
    %cst_28 = arith.constant dense<0.000000e+00> : vector<8x49xf32>
    %84 = tpu.matmul %70, %83, %cst_28 {dimension_numbers = #tpu.dot_dimension_numbers<[1], [0], [0], [1], [0, 0, 1, 1], [], []>} : vector<8x49xf32>, vector<49x49xf32>, vector<8x49xf32> -> vector<8x49xf32>
    %85 = vector.extract_strided_slice %84 {offsets = [0, 0], sizes = [8, 7], strides = [1, 1]} : vector<8x49xf32> to vector<8x7xf32>
    %c0_29 = arith.constant 0 : index
    %c0_30 = arith.constant 0 : index
    %c7 = arith.constant 7 : index
    %86 = vector.load %arg4[%c0_29, %c0_30, %c7] : memref<1x8x196xf32, #tpu.memory_space<vmem>>, vector<1x8x7xf32>
    %87 = vector.shape_cast %86 : vector<1x8x7xf32> to vector<8x7xf32>
    %88 = vector.shape_cast %85 : vector<8x7xf32> to vector<1x8x7xf32>
    tpu.vector_store %arg4[%c0_29, %c0_30, %c7], %88 {strides = array<i32>} : memref<1x8x196xf32, #tpu.memory_space<vmem>>, vector<1x8x7xf32>,
    %89 = vector.extract_strided_slice %84 {offsets = [0, 7], sizes = [8, 7], strides = [1, 1]} : vector<8x49xf32> to vector<8x7xf32>
    %c0_31 = arith.constant 0 : index
    %c0_32 = arith.constant 0 : index
    %c21 = arith.constant 21 : index
    %90 = vector.load %arg4[%c0_31, %c0_32, %c21] : memref<1x8x196xf32, #tpu.memory_space<vmem>>, vector<1x8x7xf32>
    %91 = vector.shape_cast %90 : vector<1x8x7xf32> to vector<8x7xf32>
    %92 = vector.shape_cast %89 : vector<8x7xf32> to vector<1x8x7xf32>
    tpu.vector_store %arg4[%c0_31, %c0_32, %c21], %92 {strides = array<i32>} : memref<1x8x196xf32, #tpu.memory_space<vmem>>, vector<1x8x7xf32>,
    %93 = vector.extract_strided_slice %84 {offsets = [0, 14], sizes = [8, 7], strides = [1, 1]} : vector<8x49xf32> to vector<8x7xf32>
    %c0_33 = arith.constant 0 : index
    %c0_34 = arith.constant 0 : index
    %c35 = arith.constant 35 : index
    %94 = vector.load %arg4[%c0_33, %c0_34, %c35] : memref<1x8x196xf32, #tpu.memory_space<vmem>>, vector<1x8x7xf32>
    %95 = vector.shape_cast %94 : vector<1x8x7xf32> to vector<8x7xf32>
    %96 = vector.shape_cast %93 : vector<8x7xf32> to vector<1x8x7xf32>
    tpu.vector_store %arg4[%c0_33, %c0_34, %c35], %96 {strides = array<i32>} : memref<1x8x196xf32, #tpu.memory_space<vmem>>, vector<1x8x7xf32>,
    %97 = vector.extract_strided_slice %84 {offsets = [0, 21], sizes = [8, 7], strides = [1, 1]} : vector<8x49xf32> to vector<8x7xf32>
    %c0_35 = arith.constant 0 : index
    %c0_36 = arith.constant 0 : index
    %c49 = arith.constant 49 : index
    %98 = vector.load %arg4[%c0_35, %c0_36, %c49] : memref<1x8x196xf32, #tpu.memory_space<vmem>>, vector<1x8x7xf32>
    %99 = vector.shape_cast %98 : vector<1x8x7xf32> to vector<8x7xf32>
    %100 = vector.shape_cast %97 : vector<8x7xf32> to vector<1x8x7xf32>
    tpu.vector_store %arg4[%c0_35, %c0_36, %c49], %100 {strides = array<i32>} : memref<1x8x196xf32, #tpu.memory_space<vmem>>, vector<1x8x7xf32>,
    %101 = vector.extract_strided_slice %84 {offsets = [0, 28], sizes = [8, 7], strides = [1, 1]} : vector<8x49xf32> to vector<8x7xf32>
    %c0_37 = arith.constant 0 : index
    %c0_38 = arith.constant 0 : index
    %c63 = arith.constant 63 : index
    %102 = vector.load %arg4[%c0_37, %c0_38, %c63] : memref<1x8x196xf32, #tpu.memory_space<vmem>>, vector<1x8x7xf32>
    %103 = vector.shape_cast %102 : vector<1x8x7xf32> to vector<8x7xf32>
    %104 = vector.shape_cast %101 : vector<8x7xf32> to vector<1x8x7xf32>
    tpu.vector_store %arg4[%c0_37, %c0_38, %c63], %104 {strides = array<i32>} : memref<1x8x196xf32, #tpu.memory_space<vmem>>, vector<1x8x7xf32>,
    %105 = vector.extract_strided_slice %84 {offsets = [0, 35], sizes = [8, 7], strides = [1, 1]} : vector<8x49xf32> to vector<8x7xf32>
    %c0_39 = arith.constant 0 : index
    %c0_40 = arith.constant 0 : index
    %c77 = arith.constant 77 : index
    %106 = vector.load %arg4[%c0_39, %c0_40, %c77] : memref<1x8x196xf32, #tpu.memory_space<vmem>>, vector<1x8x7xf32>
    %107 = vector.shape_cast %106 : vector<1x8x7xf32> to vector<8x7xf32>
    %108 = vector.shape_cast %105 : vector<8x7xf32> to vector<1x8x7xf32>
    tpu.vector_store %arg4[%c0_39, %c0_40, %c77], %108 {strides = array<i32>} : memref<1x8x196xf32, #tpu.memory_space<vmem>>, vector<1x8x7xf32>,
    %109 = vector.extract_strided_slice %84 {offsets = [0, 42], sizes = [8, 7], strides = [1, 1]} : vector<8x49xf32> to vector<8x7xf32>
    %c0_41 = arith.constant 0 : index
    %c0_42 = arith.constant 0 : index
    %c91 = arith.constant 91 : index
    %110 = vector.load %arg4[%c0_41, %c0_42, %c91] : memref<1x8x196xf32, #tpu.memory_space<vmem>>, vector<1x8x7xf32>
    %111 = vector.shape_cast %110 : vector<1x8x7xf32> to vector<8x7xf32>
    %112 = vector.shape_cast %109 : vector<8x7xf32> to vector<1x8x7xf32>
    tpu.vector_store %arg4[%c0_41, %c0_42, %c91], %112 {strides = array<i32>} : memref<1x8x196xf32, #tpu.memory_space<vmem>>, vector<1x8x7xf32>,
    %113 = vector.extract_strided_slice %6 {offsets = [0, 98], sizes = [24, 7], strides = [1, 1]} : vector<24x196xf32> to vector<24x7xf32>
    %114 = vector.extract_strided_slice %6 {offsets = [0, 112], sizes = [24, 7], strides = [1, 1]} : vector<24x196xf32> to vector<24x7xf32>
    %115 = vector.extract_strided_slice %6 {offsets = [0, 126], sizes = [24, 7], strides = [1, 1]} : vector<24x196xf32> to vector<24x7xf32>
    %116 = vector.extract_strided_slice %6 {offsets = [0, 140], sizes = [24, 7], strides = [1, 1]} : vector<24x196xf32> to vector<24x7xf32>
    %117 = vector.extract_strided_slice %6 {offsets = [0, 154], sizes = [24, 7], strides = [1, 1]} : vector<24x196xf32> to vector<24x7xf32>
    %118 = vector.extract_strided_slice %6 {offsets = [0, 168], sizes = [24, 7], strides = [1, 1]} : vector<24x196xf32> to vector<24x7xf32>
    %119 = vector.extract_strided_slice %6 {offsets = [0, 182], sizes = [24, 7], strides = [1, 1]} : vector<24x196xf32> to vector<24x7xf32>
    %120 = tpu.concatenate %113, %114, %115, %116, %117, %118, %119 in 1 : vector<24x7xf32>, vector<24x7xf32>, vector<24x7xf32>, vector<24x7xf32>, vector<24x7xf32>, vector<24x7xf32>, vector<24x7xf32> -> vector<24x49xf32>
    %121 = vector.extract_strided_slice %120 {offsets = [0, 0], sizes = [8, 49], strides = [1, 1]} : vector<24x49xf32> to vector<8x49xf32>
    %122 = vector.extract_strided_slice %120 {offsets = [8, 0], sizes = [8, 49], strides = [1, 1]} : vector<24x49xf32> to vector<8x49xf32>
    %123 = vector.extract_strided_slice %120 {offsets = [16, 0], sizes = [8, 49], strides = [1, 1]} : vector<24x49xf32> to vector<8x49xf32>
    %124 = tpu.transpose %121, [1, 0] : vector<8x49xf32> -> vector<49x8xf32>
    %cst_43 = arith.constant dense<0.000000e+00> : vector<49x49xf32>
    %125 = tpu.matmul %124, %122, %cst_43 {dimension_numbers = #tpu.dot_dimension_numbers<[1], [0], [0], [1], [0, 0, 1, 1], [], []>} : vector<49x8xf32>, vector<8x49xf32>, vector<49x49xf32> -> vector<49x49xf32>
    %cst_44 = arith.constant dense<0xFF800000> : vector<49xf32>
    %126 = vector.multi_reduction <maximumf>, %125, %cst_44 [1] : vector<49x49xf32> to vector<49xf32>
    %127 = vector.shape_cast %126 : vector<49xf32> to vector<49x1xf32>
    %128 = vector.broadcast %127 : vector<49x1xf32> to vector<49x49xf32>
    %129 = arith.subf %125, %128 : vector<49x49xf32>
    %130 = math.exp %129 : vector<49x49xf32>
    %cst_45 = arith.constant dense<0.000000e+00> : vector<49xf32>
    %131 = vector.multi_reduction <add>, %130, %cst_45 [1] : vector<49x49xf32> to vector<49xf32>
    %132 = vector.shape_cast %131 : vector<49xf32> to vector<49x1xf32>
    %133 = tpu.reciprocal %132 {approx = true} : vector<49x1xf32> -> vector<49x1xf32>
    %134 = vector.broadcast %133 : vector<49x1xf32> to vector<49x49xf32>
    %135 = arith.mulf %130, %134 : vector<49x49xf32>
    %136 = tpu.transpose %135, [1, 0] : vector<49x49xf32> -> vector<49x49xf32>
    %cst_46 = arith.constant dense<0.000000e+00> : vector<8x49xf32>
    %137 = tpu.matmul %123, %136, %cst_46 {dimension_numbers = #tpu.dot_dimension_numbers<[1], [0], [0], [1], [0, 0, 1, 1], [], []>} : vector<8x49xf32>, vector<49x49xf32>, vector<8x49xf32> -> vector<8x49xf32>
    %138 = vector.extract_strided_slice %137 {offsets = [0, 0], sizes = [8, 7], strides = [1, 1]} : vector<8x49xf32> to vector<8x7xf32>
    %c0_47 = arith.constant 0 : index
    %c0_48 = arith.constant 0 : index
    %c98 = arith.constant 98 : index
    %139 = vector.load %arg4[%c0_47, %c0_48, %c98] : memref<1x8x196xf32, #tpu.memory_space<vmem>>, vector<1x8x7xf32>
    %140 = vector.shape_cast %139 : vector<1x8x7xf32> to vector<8x7xf32>
    %141 = vector.shape_cast %138 : vector<8x7xf32> to vector<1x8x7xf32>
    tpu.vector_store %arg4[%c0_47, %c0_48, %c98], %141 {strides = array<i32>} : memref<1x8x196xf32, #tpu.memory_space<vmem>>, vector<1x8x7xf32>,
    %142 = vector.extract_strided_slice %137 {offsets = [0, 7], sizes = [8, 7], strides = [1, 1]} : vector<8x49xf32> to vector<8x7xf32>
    %c0_49 = arith.constant 0 : index
    %c0_50 = arith.constant 0 : index
    %c112 = arith.constant 112 : index
    %143 = vector.load %arg4[%c0_49, %c0_50, %c112] : memref<1x8x196xf32, #tpu.memory_space<vmem>>, vector<1x8x7xf32>
    %144 = vector.shape_cast %143 : vector<1x8x7xf32> to vector<8x7xf32>
    %145 = vector.shape_cast %142 : vector<8x7xf32> to vector<1x8x7xf32>
    tpu.vector_store %arg4[%c0_49, %c0_50, %c112], %145 {strides = array<i32>} : memref<1x8x196xf32, #tpu.memory_space<vmem>>, vector<1x8x7xf32>,
    %146 = vector.extract_strided_slice %137 {offsets = [0, 14], sizes = [8, 7], strides = [1, 1]} : vector<8x49xf32> to vector<8x7xf32>
    %c0_51 = arith.constant 0 : index
    %c0_52 = arith.constant 0 : index
    %c126 = arith.constant 126 : index
    %147 = vector.load %arg4[%c0_51, %c0_52, %c126] : memref<1x8x196xf32, #tpu.memory_space<vmem>>, vector<1x8x7xf32>
    %148 = vector.shape_cast %147 : vector<1x8x7xf32> to vector<8x7xf32>
    %149 = vector.shape_cast %146 : vector<8x7xf32> to vector<1x8x7xf32>
    tpu.vector_store %arg4[%c0_51, %c0_52, %c126], %149 {strides = array<i32>} : memref<1x8x196xf32, #tpu.memory_space<vmem>>, vector<1x8x7xf32>,
    %150 = vector.extract_strided_slice %137 {offsets = [0, 21], sizes = [8, 7], strides = [1, 1]} : vector<8x49xf32> to vector<8x7xf32>
    %c0_53 = arith.constant 0 : index
    %c0_54 = arith.constant 0 : index
    %c140 = arith.constant 140 : index
    %151 = vector.load %arg4[%c0_53, %c0_54, %c140] : memref<1x8x196xf32, #tpu.memory_space<vmem>>, vector<1x8x7xf32>
    %152 = vector.shape_cast %151 : vector<1x8x7xf32> to vector<8x7xf32>
    %153 = vector.shape_cast %150 : vector<8x7xf32> to vector<1x8x7xf32>
    tpu.vector_store %arg4[%c0_53, %c0_54, %c140], %153 {strides = array<i32>} : memref<1x8x196xf32, #tpu.memory_space<vmem>>, vector<1x8x7xf32>,
    %154 = vector.extract_strided_slice %137 {offsets = [0, 28], sizes = [8, 7], strides = [1, 1]} : vector<8x49xf32> to vector<8x7xf32>
    %c0_55 = arith.constant 0 : index
    %c0_56 = arith.constant 0 : index
    %c154 = arith.constant 154 : index
    %155 = vector.load %arg4[%c0_55, %c0_56, %c154] : memref<1x8x196xf32, #tpu.memory_space<vmem>>, vector<1x8x7xf32>
    %156 = vector.shape_cast %155 : vector<1x8x7xf32> to vector<8x7xf32>
    %157 = vector.shape_cast %154 : vector<8x7xf32> to vector<1x8x7xf32>
    tpu.vector_store %arg4[%c0_55, %c0_56, %c154], %157 {strides = array<i32>} : memref<1x8x196xf32, #tpu.memory_space<vmem>>, vector<1x8x7xf32>,
    %158 = vector.extract_strided_slice %137 {offsets = [0, 35], sizes = [8, 7], strides = [1, 1]} : vector<8x49xf32> to vector<8x7xf32>
    %c0_57 = arith.constant 0 : index
    %c0_58 = arith.constant 0 : index
    %c168 = arith.constant 168 : index
    %159 = vector.load %arg4[%c0_57, %c0_58, %c168] : memref<1x8x196xf32, #tpu.memory_space<vmem>>, vector<1x8x7xf32>
    %160 = vector.shape_cast %159 : vector<1x8x7xf32> to vector<8x7xf32>
    %161 = vector.shape_cast %158 : vector<8x7xf32> to vector<1x8x7xf32>
    tpu.vector_store %arg4[%c0_57, %c0_58, %c168], %161 {strides = array<i32>} : memref<1x8x196xf32, #tpu.memory_space<vmem>>, vector<1x8x7xf32>,
    %162 = vector.extract_strided_slice %137 {offsets = [0, 42], sizes = [8, 7], strides = [1, 1]} : vector<8x49xf32> to vector<8x7xf32>
    %c0_59 = arith.constant 0 : index
    %c0_60 = arith.constant 0 : index
    %c182 = arith.constant 182 : index
    %163 = vector.load %arg4[%c0_59, %c0_60, %c182] : memref<1x8x196xf32, #tpu.memory_space<vmem>>, vector<1x8x7xf32>
    %164 = vector.shape_cast %163 : vector<1x8x7xf32> to vector<8x7xf32>
    %165 = vector.shape_cast %162 : vector<8x7xf32> to vector<1x8x7xf32>
    tpu.vector_store %arg4[%c0_59, %c0_60, %c182], %165 {strides = array<i32>} : memref<1x8x196xf32, #tpu.memory_space<vmem>>, vector<1x8x7xf32>,
    %166 = vector.extract_strided_slice %6 {offsets = [0, 105], sizes = [24, 7], strides = [1, 1]} : vector<24x196xf32> to vector<24x7xf32>
    %167 = vector.extract_strided_slice %6 {offsets = [0, 119], sizes = [24, 7], strides = [1, 1]} : vector<24x196xf32> to vector<24x7xf32>
    %168 = vector.extract_strided_slice %6 {offsets = [0, 133], sizes = [24, 7], strides = [1, 1]} : vector<24x196xf32> to vector<24x7xf32>
    %169 = vector.extract_strided_slice %6 {offsets = [0, 147], sizes = [24, 7], strides = [1, 1]} : vector<24x196xf32> to vector<24x7xf32>
    %170 = vector.extract_strided_slice %6 {offsets = [0, 161], sizes = [24, 7], strides = [1, 1]} : vector<24x196xf32> to vector<24x7xf32>
    %171 = vector.extract_strided_slice %6 {offsets = [0, 175], sizes = [24, 7], strides = [1, 1]} : vector<24x196xf32> to vector<24x7xf32>
    %172 = vector.extract_strided_slice %6 {offsets = [0, 189], sizes = [24, 7], strides = [1, 1]} : vector<24x196xf32> to vector<24x7xf32>
    %173 = tpu.concatenate %166, %167, %168, %169, %170, %171, %172 in 1 : vector<24x7xf32>, vector<24x7xf32>, vector<24x7xf32>, vector<24x7xf32>, vector<24x7xf32>, vector<24x7xf32>, vector<24x7xf32> -> vector<24x49xf32>
    %174 = vector.extract_strided_slice %173 {offsets = [0, 0], sizes = [8, 49], strides = [1, 1]} : vector<24x49xf32> to vector<8x49xf32>
    %175 = vector.extract_strided_slice %173 {offsets = [8, 0], sizes = [8, 49], strides = [1, 1]} : vector<24x49xf32> to vector<8x49xf32>
    %176 = vector.extract_strided_slice %173 {offsets = [16, 0], sizes = [8, 49], strides = [1, 1]} : vector<24x49xf32> to vector<8x49xf32>
    %177 = tpu.transpose %174, [1, 0] : vector<8x49xf32> -> vector<49x8xf32>
    %cst_61 = arith.constant dense<0.000000e+00> : vector<49x49xf32>
    %178 = tpu.matmul %177, %175, %cst_61 {dimension_numbers = #tpu.dot_dimension_numbers<[1], [0], [0], [1], [0, 0, 1, 1], [], []>} : vector<49x8xf32>, vector<8x49xf32>, vector<49x49xf32> -> vector<49x49xf32>
    %cst_62 = arith.constant dense<0xFF800000> : vector<49xf32>
    %179 = vector.multi_reduction <maximumf>, %178, %cst_62 [1] : vector<49x49xf32> to vector<49xf32>
    %180 = vector.shape_cast %179 : vector<49xf32> to vector<49x1xf32>
    %181 = vector.broadcast %180 : vector<49x1xf32> to vector<49x49xf32>
    %182 = arith.subf %178, %181 : vector<49x49xf32>
    %183 = math.exp %182 : vector<49x49xf32>
    %cst_63 = arith.constant dense<0.000000e+00> : vector<49xf32>
    %184 = vector.multi_reduction <add>, %183, %cst_63 [1] : vector<49x49xf32> to vector<49xf32>
    %185 = vector.shape_cast %184 : vector<49xf32> to vector<49x1xf32>
    %186 = tpu.reciprocal %185 {approx = true} : vector<49x1xf32> -> vector<49x1xf32>
    %187 = vector.broadcast %186 : vector<49x1xf32> to vector<49x49xf32>
    %188 = arith.mulf %183, %187 : vector<49x49xf32>
    %189 = tpu.transpose %188, [1, 0] : vector<49x49xf32> -> vector<49x49xf32>
    %cst_64 = arith.constant dense<0.000000e+00> : vector<8x49xf32>
    %190 = tpu.matmul %176, %189, %cst_64 {dimension_numbers = #tpu.dot_dimension_numbers<[1], [0], [0], [1], [0, 0, 1, 1], [], []>} : vector<8x49xf32>, vector<49x49xf32>, vector<8x49xf32> -> vector<8x49xf32>
    %191 = vector.extract_strided_slice %190 {offsets = [0, 0], sizes = [8, 7], strides = [1, 1]} : vector<8x49xf32> to vector<8x7xf32>
    %c0_65 = arith.constant 0 : index
    %c0_66 = arith.constant 0 : index
    %c105 = arith.constant 105 : index
    %192 = vector.load %arg4[%c0_65, %c0_66, %c105] : memref<1x8x196xf32, #tpu.memory_space<vmem>>, vector<1x8x7xf32>
    %193 = vector.shape_cast %192 : vector<1x8x7xf32> to vector<8x7xf32>
    %194 = vector.shape_cast %191 : vector<8x7xf32> to vector<1x8x7xf32>
    tpu.vector_store %arg4[%c0_65, %c0_66, %c105], %194 {strides = array<i32>} : memref<1x8x196xf32, #tpu.memory_space<vmem>>, vector<1x8x7xf32>,
    %195 = vector.extract_strided_slice %190 {offsets = [0, 7], sizes = [8, 7], strides = [1, 1]} : vector<8x49xf32> to vector<8x7xf32>
    %c0_67 = arith.constant 0 : index
    %c0_68 = arith.constant 0 : index
    %c119 = arith.constant 119 : index
    %196 = vector.load %arg4[%c0_67, %c0_68, %c119] : memref<1x8x196xf32, #tpu.memory_space<vmem>>, vector<1x8x7xf32>
    %197 = vector.shape_cast %196 : vector<1x8x7xf32> to vector<8x7xf32>
    %198 = vector.shape_cast %195 : vector<8x7xf32> to vector<1x8x7xf32>
    tpu.vector_store %arg4[%c0_67, %c0_68, %c119], %198 {strides = array<i32>} : memref<1x8x196xf32, #tpu.memory_space<vmem>>, vector<1x8x7xf32>,
    %199 = vector.extract_strided_slice %190 {offsets = [0, 14], sizes = [8, 7], strides = [1, 1]} : vector<8x49xf32> to vector<8x7xf32>
    %c0_69 = arith.constant 0 : index
    %c0_70 = arith.constant 0 : index
    %c133 = arith.constant 133 : index
    %200 = vector.load %arg4[%c0_69, %c0_70, %c133] : memref<1x8x196xf32, #tpu.memory_space<vmem>>, vector<1x8x7xf32>
    %201 = vector.shape_cast %200 : vector<1x8x7xf32> to vector<8x7xf32>
    %202 = vector.shape_cast %199 : vector<8x7xf32> to vector<1x8x7xf32>
    tpu.vector_store %arg4[%c0_69, %c0_70, %c133], %202 {strides = array<i32>} : memref<1x8x196xf32, #tpu.memory_space<vmem>>, vector<1x8x7xf32>,
    %203 = vector.extract_strided_slice %190 {offsets = [0, 21], sizes = [8, 7], strides = [1, 1]} : vector<8x49xf32> to vector<8x7xf32>
    %c0_71 = arith.constant 0 : index
    %c0_72 = arith.constant 0 : index
    %c147 = arith.constant 147 : index
    %204 = vector.load %arg4[%c0_71, %c0_72, %c147] : memref<1x8x196xf32, #tpu.memory_space<vmem>>, vector<1x8x7xf32>
    %205 = vector.shape_cast %204 : vector<1x8x7xf32> to vector<8x7xf32>
    %206 = vector.shape_cast %203 : vector<8x7xf32> to vector<1x8x7xf32>
    tpu.vector_store %arg4[%c0_71, %c0_72, %c147], %206 {strides = array<i32>} : memref<1x8x196xf32, #tpu.memory_space<vmem>>, vector<1x8x7xf32>,
    %207 = vector.extract_strided_slice %190 {offsets = [0, 28], sizes = [8, 7], strides = [1, 1]} : vector<8x49xf32> to vector<8x7xf32>
    %c0_73 = arith.constant 0 : index
    %c0_74 = arith.constant 0 : index
    %c161 = arith.constant 161 : index
    %208 = vector.load %arg4[%c0_73, %c0_74, %c161] : memref<1x8x196xf32, #tpu.memory_space<vmem>>, vector<1x8x7xf32>
    %209 = vector.shape_cast %208 : vector<1x8x7xf32> to vector<8x7xf32>
    %210 = vector.shape_cast %207 : vector<8x7xf32> to vector<1x8x7xf32>
    tpu.vector_store %arg4[%c0_73, %c0_74, %c161], %210 {strides = array<i32>} : memref<1x8x196xf32, #tpu.memory_space<vmem>>, vector<1x8x7xf32>,
    %211 = vector.extract_strided_slice %190 {offsets = [0, 35], sizes = [8, 7], strides = [1, 1]} : vector<8x49xf32> to vector<8x7xf32>
    %c0_75 = arith.constant 0 : index
    %c0_76 = arith.constant 0 : index
    %c175 = arith.constant 175 : index
    %212 = vector.load %arg4[%c0_75, %c0_76, %c175] : memref<1x8x196xf32, #tpu.memory_space<vmem>>, vector<1x8x7xf32>
    %213 = vector.shape_cast %212 : vector<1x8x7xf32> to vector<8x7xf32>
    %214 = vector.shape_cast %211 : vector<8x7xf32> to vector<1x8x7xf32>
    tpu.vector_store %arg4[%c0_75, %c0_76, %c175], %214 {strides = array<i32>} : memref<1x8x196xf32, #tpu.memory_space<vmem>>, vector<1x8x7xf32>,
    %215 = vector.extract_strided_slice %190 {offsets = [0, 42], sizes = [8, 7], strides = [1, 1]} : vector<8x49xf32> to vector<8x7xf32>
    %c0_77 = arith.constant 0 : index
    %c0_78 = arith.constant 0 : index
    %c189 = arith.constant 189 : index
    %216 = vector.load %arg4[%c0_77, %c0_78, %c189] : memref<1x8x196xf32, #tpu.memory_space<vmem>>, vector<1x8x7xf32>
    %217 = vector.shape_cast %216 : vector<1x8x7xf32> to vector<8x7xf32>
    %218 = vector.shape_cast %215 : vector<8x7xf32> to vector<1x8x7xf32>
    tpu.vector_store %arg4[%c0_77, %c0_78, %c189], %218 {strides = array<i32>} : memref<1x8x196xf32, #tpu.memory_space<vmem>>, vector<1x8x7xf32>,
    return
  }
  func.func @transform_0(%arg0: i32) -> (i32, i32, i32) {
    %c0_i32 = arith.constant 0 : i32
    %c0_i32_0 = arith.constant 0 : i32
    %c0_i32_1 = arith.constant 0 : i32
    return %arg0, %c0_i32, %c0_i32_0 : i32, i32, i32
  }
  func.func @transform_1(%arg0: i32) -> (i32, i32) {
    %c0_i32 = arith.constant 0 : i32
    %c0_i32_0 = arith.constant 0 : i32
    %c0_i32_1 = arith.constant 0 : i32
    return %c0_i32, %c0_i32_0 : i32, i32
  }
  func.func @transform_2(%arg0: i32) -> (i32, i32) {
    %c0_i32 = arith.constant 0 : i32
    %c0_i32_0 = arith.constant 0 : i32
    %c0_i32_1 = arith.constant 0 : i32
    return %c0_i32, %c0_i32_0 : i32, i32
  }
  func.func @transform_3(%arg0: i32) -> (i32, i32, i32) {
    %c0_i32 = arith.constant 0 : i32
    %c0_i32_0 = arith.constant 0 : i32
    %c0_i32_1 = arith.constant 0 : i32
    return %arg0, %c0_i32, %c0_i32_0 : i32, i32, i32
  }
}

</mosaic_0001>

<bundles_post_ra>
// kernel: tpu_custom_call.1
= control target key start
LH: loop header
LB: loop body
LE: loop exit
PB: predicated region body
PF: predicated region fallthrough
CT: control target
= control target key end

     0   :  { %8 = vsyncpa [#allocation3], 0  ;;  %s3433_s0 = inlined_call_operand.vmem [shape: f32[2,8,196], index: 0, kind: input, shape index: {}]   ;;  %s3434_s1 = inlined_call_operand.vmem [shape: f32[24,8], index: 1, kind: input, shape index: {}]   ;;  %s3435_s2 = inlined_call_operand.vmem [shape: f32[24,1], index: 2, kind: input, shape index: {}]   ;;  %s3436_s3 = inlined_call_operand.hbm [shape: f32[2,8,196], index: 3, kind: output, shape index: {}]  }
   0x1   :  { %10 = vsyncpa [#allocation3 + $0x1], 0  ;;  %s2633_s12 = smov 0   ;;  %s2635_s13 = smov 0  }
   0x2   :  { %s2637_s14 = smov 0   ;;  %s2639_s15 = smov 0  }
   0x3 LB: > { %s2654_s16 = sadd.s32 4294967295, %s2577_s15   ;;  %s2031_s17 = sadd.s32 4294967294, %s2577_s15   ;;  %s2577_s15 = sphi %s2639_s15, %s3442_s15   ;;  %s2573_s14 = sphi %s2637_s14, %s3441_s14   ;;  %s2569_s13 = sphi %s2635_s13, %s3440_s13   ;;  %s2565_s12 = sphi %s2633_s12, %s3439_s12  }
   0x4   : > { %s2658_s18 = sadd.s32 1, %s2577_s15   ;;  %s91_s19 = sadd.s32 1, %s2573_s14 }
   0x5   : > { %s88_s20 = ssub.s32 %s2577_s15, %s2658_s18  ;;  %p101_p0 = scmp.ne.s32.totalorder %s2573_s14, %s2569_s13 }
   0x6   : > { %p89_p1 = scmp.eq.s32.totalorder %s88_s20, 0  ;;  %p102_p2 = scmp.eq.s32.totalorder %s2654_s16, 1 }
   0x7   : > { %p107_p3 = scmp.ne.s32.totalorder %s2569_s13, %s2565_s12  ;;  %p108_p4 = scmp.eq.s32.totalorder %s2031_s17, 1 }
   0x8   : > { %s2669_s21 = scalar_select %p89_p1, %s2573_s14, %s91_s19  }
   0x9   : > { %p2671_p5 = por %p102_p2, %p101_p0  ;;  %p2675_p6 = por %p108_p4, %p107_p3 }
   0xa   : > { %p2034_p7 = scmp.ge.s32.totalorder %s2577_s15, 1  ;;  %p140_p8 = scmp.lt.s32.totalorder %s2577_s15, 3 }
   0xc   : > { %p141_p9 = pnand %p2034_p7, %p140_p8 }
   0xd   : > { %p164_p10 = scmp.lt.s32.totalorder (!%p141_p9), %s2654_s16, 1  ;;  %s2581_s10 = smov (!%p141_p9), 107  }
   0xe   : > { %144 = sbr.rel (%p141_p9) target bundleno = 1531 (0x5fb), region = 32  ;;  %s2582_s11 = smov (!%p141_p9), 121  }
   0xf   : > { %s2583_s17 = smov (!%p141_p9), 93   ;;  %s2584_s19 = smov (!%p141_p9), 114  }
  0x10   : > { %s2585_s20 = smov (!%p141_p9), 79   ;;  %s2586_s24 = smov (!%p141_p9), 100  }
  0x11   : > { %s2587_s25 = smov (!%p141_p9), 23   ;;  %s2589_s27 = smov (!%p141_p9), 16  }
  0x12   : > { %s2590_s28 = smov (!%p141_p9), 30   ;;  %s2592_s30 = smov (!%p141_p9), 116  }
  0x13   : > { %v2579_v0 = vmov 0.0   ;;  %v2580_v1 = vmov 0   ;;  %v172_v2 = vld [vmem:[%s3435_s2] sm:$0xff]  ;;  %s165_s26 = scalar_select %p164_p10, %s2654_s16, 1  ;;  %v173_v3 = vld [vmem:[%s3435_s2 + $0x8] sm:$0xff]  ;;  %vm192_vm0 = vcmask 64512  }
  0x14   : > { %266 = vmatprep.mubr.f32.mxu0 %v2579_v0  ;;  %2404 = vset.pattern.permute.xlu0 %v2580_v1  ;;  %v169_v6 = vld [vmem:[%s3434_s1] sm:$0xff]  ;;  %v170_v7 = vld [vmem:[%s3434_s1 + $0x8] sm:$0xff]  ;;  %s2593_s4 = smov 9   ;;  %s2595_s6 = smov 123   ;;  %v171_v18 = vld [vmem:[%s3434_s1 + $0x10] sm:$0xff]  ;;  %vm2596_vm1 = vmmov 0  }
  0x15   : > { %179 = vperm.xlu0 %2404, %v172_v2   ;;  %2172 = vmatprep.subr.mxu1 %v2579_v0  ;;  %s2106_s29 = sshll.u32 %s165_s26, 4  ;;  %s2588_s26 = smov 86   ;;  %vm342_vm2 = vcmask 56320   ;;  %vm346_vm3 = vcmask 113664   ;;  %vm350_vm4 = vcmask 171008   ;;  %vm354_vm5 = vcmask 228352  }
  0x16   : > { %s168_s5 = scalar_lea.vmem %s3433_s0, %s2106_s29  ;;  %s2591_s29 = smov 2   ;;  %2174 = vmatprep.mubr.msk.f32.mxu1 %vm2596_vm1, %v2579_v0  ;;  %vm358_vm6 = vcmask 285696   ;;  %vm362_vm7 = vcmask 343040   ;;  %vm1144_vm8 = vcmask 130048   ;;  %vm519_vm9 = vcmask 400384  }
  0x17   : > { %v176_v4 = vld [vmem:[%s168_s5 + $0x8] sm:$0xff]  ;;  %v175_v5 = vld [vmem:[%s168_s5] sm:$0xff]  ;;  %s2594_s5 = smov 109   ;;  %vm538_vm10 = vcmask 393216   ;;  %vm697_vm11 = vcmask 171120   ;;  %vm702_vm12 = vcmask 285920  }
  0x18   : > { %232 = vmatprep.subr.mxu0 %v176_v4  ;;  %vm707_vm13 = vcmask 400720   ;;  %vm712_vm14 = vcmask 515520   ;;  %vm717_vm15 = vcmask 630320   ;;  %s2609_s8 = smov 5   ;;  %s2610_s9 = smov 12  }
  0x19   : > { %184 = vperm.xlu0 %2404, %v173_v3   ;;  %233 = vmatpush1.msra.mxu0 %v175_v5  ;;  %s2611_s7 = smov 19  }
  0x1a   : > { %2038 = vmatmul.mubr.msk.f32.vlgmr.msra.gmra.mxu0 %vm192_vm0, %v169_v6  ;;  %2195 = vmatprep.subr.mxu0 %v2579_v0 }
  0x1b   : > { %272 = vmatprep.mubr.f32.mxu0 %v2579_v0 }
  0x1e   : > { %2039 = vmatmul.mubr.msk.f32.gmra.mxu0 %vm192_vm0, %v170_v7 }
  0x1f   : > { %278 = vmatprep.mubr.f32.mxu0 %v2579_v0 }
  0x22   : > { %2040 = vmatmul.mubr.msk.f32.gmra.mxu0 %vm192_vm0, %v171_v18 }
  0x23   : > { %2209 = vmatprep.mubr.msk.f32.mxu0 %vm2596_vm1, %v2579_v0 }
  0x90   : > { %v180_v8 = vpop.permute.xlu0 %179 }
  0x94   : > { %v185_v14 = vpop.permute.xlu0 %184 }
  0xda   : > { %v268_v9 = vpop.f32.mrf.mxu0 }
  0xdb   : > { %v2705_v10 = vadd.f32 %v268_v9, %v180_v8 }
  0xdc   : > { %v270_v11 = vpop.f32.mrf.mxu0 }
  0xdd   : > { %306 = vrot.lane.b32.xlu0 %v2705_v10, %s2581_s10  ;;  %288 = vrot.lane.b32.xlu1 %v2705_v10, %s2582_s11  ;;  %v271_v12 = vadd.f32 %v270_v11, %v180_v8 }
  0xde   : > { %v274_v13 = vpop.f32.mrf.mxu0 }
  0xdf   : > { %v275_v15 = vadd.f32 %v274_v13, %v185_v14 }
  0xe0   : > { %v276_v16 = vpop.f32.mrf.mxu0 }
  0xe1   : > { %324 = vrot.lane.b32.xlu0 %v2705_v10, %s2583_s17  ;;  %297 = vrot.lane.b32.xlu1 %v2705_v10, %s2584_s19  ;;  %v277_v17 = vadd.f32 %v276_v16, %v185_v14 }
  0xe5   : > { %724 = vrot.lane.b32.xlu0 %v2705_v10, %s2585_s20  ;;  %315 = vrot.lane.b32.xlu1 %v2705_v10, %s2586_s24 }
  0xe9   : > { %1120 = vrot.lane.b32.xlu0 %v2705_v10, %s2587_s25  ;;  %333 = vrot.lane.b32.xlu1 %v2705_v10, %s2588_s26 }
  0xed   : > { %1134 = vrot.lane.b32.xlu0 %v271_v12, %s2589_s27  ;;  %1111 = vrot.lane.b32.xlu1 %v2705_v10, %s2590_s28 }
  0xf1   : > { %1160 = vrot.lane.b32.xlu0 %v271_v12, %s2591_s29  ;;  %1132 = vrot.lane.b32.xlu1 %v2705_v10, %s2589_s27 }
  0xf5   : > { %1178 = vrot.lane.b32.xlu0 %v271_v12, %s2592_s30  ;;  %1151 = vrot.lane.b32.xlu1 %v271_v12, %s2593_s4 }
  0xf9   : > { %1570 = vrot.lane.b32.xlu0 %v271_v12, %s2594_s5  ;;  %1169 = vrot.lane.b32.xlu1 %v271_v12, %s2595_s6 }
  0xfd   : > { %290 = vrot.lane.b32.xlu0 %v275_v15, %s2582_s11  ;;  %299 = vrot.lane.b32.xlu1 %v275_v15, %s2584_s19 }
 0x101   : > { %317 = vrot.lane.b32.xlu0 %v275_v15, %s2586_s24  ;;  %308 = vrot.lane.b32.xlu1 %v275_v15, %s2581_s10 }
 0x105   : > { %335 = vrot.lane.b32.xlu0 %v275_v15, %s2588_s26  ;;  %326 = vrot.lane.b32.xlu1 %v275_v15, %s2583_s17 }
 0x109   : > { %726 = vrot.lane.b32.xlu0 %v275_v15, %s2585_s20 }
 0x10d   : > { %1113 = vrot.lane.b32.xlu0 %v275_v15, %s2590_s28 }
 0x111   : > { %1122 = vrot.lane.b32.xlu0 %v275_v15, %s2587_s25 }
 0x115   : > { %1136 = vrot.lane.b32.xlu0 %v275_v15, %s2589_s27 }
 0x119   : > { %1138 = vrot.lane.b32.xlu0 %v277_v17, %s2589_s27 }
 0x11d   : > { %1153 = vrot.lane.b32.xlu0 %v277_v17, %s2593_s4 }
 0x121   : > { %1162 = vrot.lane.b32.xlu0 %v277_v17, %s2591_s29 }
 0x125   : > { %1180 = vrot.lane.b32.xlu0 %v277_v17, %s2592_s30 }
 0x14f   : > { %v307_v19 = vpop.permute.xlu0 %306  ;;  %v289_v20 = vpop.permute.xlu1 %288 }
 0x150   : > { %v343_v21 = vsel %vm342_vm2, %v2705_v10, %v289_v20 }
 0x153   : > { %v325_v22 = vpop.permute.xlu0 %324  ;;  %v298_v23 = vpop.permute.xlu1 %297 }
 0x154   : > { %v347_v24 = vsel %vm346_vm3, %v343_v21, %v298_v23  ;;  %v733_v25 = vsel %vm342_vm2, %v289_v20, %v298_v23 }
 0x155   : > { %v351_v27 = vsel %vm350_vm4, %v347_v24, %v307_v19  ;;  %v736_v28 = vsel %vm346_vm3, %v733_v25, %v307_v19 }
 0x157   : > { %v725_v26 = vpop.permute.xlu0 %724  ;;  %v316_v29 = vpop.permute.xlu1 %315 }
 0x158   : > { %v355_v30 = vsel %vm354_vm5, %v351_v27, %v316_v29  ;;  %v739_v31 = vsel %vm350_vm4, %v736_v28, %v316_v29 }
 0x159   : > { %v742_v33 = vsel %vm354_vm5, %v739_v31, %v325_v22  ;;  %v359_v35 = vsel %vm358_vm6, %v355_v30, %v325_v22 }
 0x15b   : > { %v1121_v32 = vpop.permute.xlu0 %1120  ;;  %v334_v34 = vpop.permute.xlu1 %333 }
 0x15c   : > { %v745_v36 = vsel %vm358_vm6, %v742_v33, %v334_v34  ;;  %v363_v37 = vsel %vm362_vm7, %v359_v35, %v334_v34  ;;  %v174_v34 = vld [vmem:[%s3435_s2 + $0x10] sm:$0xff] }
 0x15d   : > { %366 = vxpose.xlu1.b32.start.end [1/1] (short) (narrow) %v363_v37, 56  ;;  %v748_v38 = vsel %vm362_vm7, %v745_v36, %v725_v26 }
 0x15e   : > { %751 = vxpose.xlu0.b32.start.end [1/1] (short) (narrow) %v748_v38, 56 }
 0x15f   : > { %v1135_v39 = vpop.permute.xlu0 %1134  ;;  %v1112_v40 = vpop.permute.xlu1 %1111 }
 0x160   : > { %v1187_v61 = vsel %vm342_vm2, %v1112_v40, %v1121_v32 }
 0x163   : > { %v1161_v41 = vpop.permute.xlu0 %1160  ;;  %v1133_v42 = vpop.permute.xlu1 %1132 }
 0x164   : > { %v1145_v59 = vsel %vm1144_vm8, %v1133_v42, %v1135_v39  ;;  %v1579_v60 = vsel %vm342_vm2, %v1121_v32, %v1133_v42 }
 0x165   : > { %v1190_v63 = vsel %vm346_vm3, %v1187_v61, %v1145_v59 }
 0x167   : > { %v1179_v43 = vpop.permute.xlu0 %1178  ;;  %v1152_v44 = vpop.permute.xlu1 %1151 }
 0x168   : > { %v1582_v62 = vsel %vm346_vm3, %v1579_v60, %v1152_v44  ;;  %v1193_v1 = vsel %vm350_vm4, %v1190_v63, %v1152_v44 }
 0x169   : > { %v1585_v2 = vsel %vm350_vm4, %v1582_v62, %v1161_v41  ;;  %v1196_v4 = vsel %vm354_vm5, %v1193_v1, %v1161_v41 }
 0x16b   : > { %v1571_v45 = vpop.permute.xlu0 %1570  ;;  %v1170_v46 = vpop.permute.xlu1 %1169 }
 0x16c   : > { %v1588_v3 = vsel %vm354_vm5, %v1585_v2, %v1170_v46  ;;  %v1199_v5 = vsel %vm358_vm6, %v1196_v4, %v1170_v46  ;;  %v280_v4 = vpop.f32.mrf.mxu0 }
 0x16d   : > { %v1591_v7 = vsel %vm358_vm6, %v1588_v3, %v1179_v43  ;;  %v1202_v8 = vsel %vm362_vm7, %v1199_v5, %v1179_v43 }
 0x16e   : > { %v1594_v9 = vsel %vm362_vm7, %v1591_v7, %v1571_v45 }
 0x16f   : > { %v291_v47 = vpop.permute.xlu0 %290  ;;  %v300_v48 = vpop.permute.xlu1 %299 }
 0x170   : > { %v344_v49 = vsel %vm342_vm2, %v275_v15, %v291_v47  ;;  %v734_v13 = vsel %vm342_vm2, %v291_v47, %v300_v48 }
 0x171   : > { %v348_v50 = vsel %vm346_vm3, %v344_v49, %v300_v48 }
 0x173   : > { %v318_v51 = vpop.permute.xlu0 %317  ;;  %v309_v52 = vpop.permute.xlu1 %308 }
 0x174   : > { %v352_v53 = vsel %vm350_vm4, %v348_v50, %v309_v52  ;;  %v737_v15 = vsel %vm346_vm3, %v734_v13, %v309_v52 }
 0x175   : > { %v356_v56 = vsel %vm354_vm5, %v352_v53, %v318_v51  ;;  %v740_v16 = vsel %vm350_vm4, %v737_v15, %v318_v51 }
 0x177   : > { %v336_v54 = vpop.permute.xlu0 %335  ;;  %v327_v55 = vpop.permute.xlu1 %326 }
 0x178   : > { %v360_v57 = vsel %vm358_vm6, %v356_v56, %v327_v55 }
 0x179   : > { %v364_v58 = vsel %vm362_vm7, %v360_v57, %v336_v54 }
 0x17a   : > { %2173 = vmatpush3.msra.mxu1 %v364_v58 }
 0x17b   : > { %2212 = vmatprep.subr.mxu1 %v2579_v0  ;;  %v727_v6 = vpop.permute.xlu0 %726 }
 0x17f   : > { %v1114_v10 = vpop.permute.xlu0 %1113 }
 0x183   : > { %v2790_v11 = vpop.permute.xlu0 %1122 }
 0x184   : > { %v1188_v37 = vsel %vm342_vm2, %v1114_v10, %v2790_v11 }
 0x187   : > { %v2792_v12 = vpop.permute.xlu0 %1136 }
 0x188   : > { %v1580_v46 = vsel %vm342_vm2, %v2790_v11, %v2792_v12 }
 0x18b   : > { %v1139_v14 = vpop.permute.xlu0 %1138 }
 0x18c   : > { %v1146_v36 = vsel %vm1144_vm8, %v2792_v12, %v1139_v14 }
 0x18d   : > { %v1191_v38 = vsel %vm346_vm3, %v1188_v37, %v1146_v36 }
 0x18f   : > { %v2798_v18 = vpop.permute.xlu0 %1153 }
 0x190   : > { %v1194_v39 = vsel %vm350_vm4, %v1191_v38, %v2798_v18  ;;  %v1583_v47 = vsel %vm346_vm3, %v1580_v46, %v2798_v18 }
 0x193   : > { %1171 = vrot.lane.b32.xlu1 %v277_v17, %s2595_s6  ;;  %v1163_v22 = vpop.permute.xlu0 %1162 }
 0x194   : > { %v1197_v40 = vsel %vm354_vm5, %v1194_v39, %v1163_v22  ;;  %v1586_v48 = vsel %vm350_vm4, %v1583_v47, %v1163_v22 }
 0x197   : > { %v1181_v25 = vpop.permute.xlu0 %1180 }
 0x19f   : > { %1572 = vrot.lane.b32.xlu0 %v277_v17, %s2594_s5  ;;  %v743_v17 = vsel %vm354_vm5, %v740_v16, %v327_v55 }
 0x1a0   : > { %v746_v19 = vsel %vm358_vm6, %v743_v17, %v336_v54 }
 0x1a1   : > { %v749_v21 = vsel %vm362_vm7, %v746_v19, %v727_v6 }
 0x1bc   : > { %1205 = vxpose.xlu1.b32.start.end [1/1] (short) (narrow) %v1202_v8, 56 }
 0x1bd   : > { %1597 = vxpose.xlu0.b32.start.end [1/1] (short) (narrow) %v1594_v9, 56 }
 0x1d9   : > { %v382_v20 = vpop.trf.xlu1 }
 0x1da   : > { %2175 = vmatmul.mubr.msk.f32.vlgmr.msra.gmra.mxu1 %vm192_vm0, %v382_v20  ;;  %v767_v27 = vpop.trf.xlu0 }
 0x1db   : > { %2213 = vmatpush3.msra.mxu1 %v749_v21  ;;  %2177 = vmatprep.mubr.msk.f32.mxu1 %vm2596_vm1, %v2579_v0 }
 0x1dc   : > { %2252 = vmatprep.subr.mxu1 %v2579_v0 }
 0x1dd   : > { %v383_v23 = vpop.trf.xlu1 }
 0x1de   : > { %2178 = vmatmul.mubr.msk.f32.gmra.mxu1 %vm192_vm0, %v383_v23  ;;  %v768_v30 = vpop.trf.xlu0 }
 0x1df   : > { %2180 = vmatprep.mubr.msk.f32.mxu1 %vm2596_vm1, %v2579_v0 }
 0x1e1   : > { %v384_v24 = vpop.trf.xlu1 }
 0x1e2   : > { %2181 = vmatmul.mubr.msk.f32.gmra.mxu1 %vm192_vm0, %v384_v24  ;;  %v769_v32 = vpop.trf.xlu0 }
 0x1e3   : > { %2183 = vmatprep.mubr.msk.f32.mxu1 %vm2596_vm1, %v2579_v0 }
 0x1e5   : > { %v385_v26 = vpop.trf.xlu1 }
 0x1e6   : > { %2184 = vmatmul.mubr.msk.f32.gmra.mxu1 %vm192_vm0, %v385_v26  ;;  %v770_v33 = vpop.trf.xlu0 }
 0x1e7   : > { %2186 = vmatprep.mubr.msk.f32.mxu1 %vm2596_vm1, %v2579_v0 }
 0x1e9   : > { %v386_v28 = vpop.trf.xlu1 }
 0x1ea   : > { %2187 = vmatmul.mubr.msk.f32.gmra.mxu1 %vm192_vm0, %v386_v28  ;;  %v771_v35 = vpop.trf.xlu0 }
 0x1eb   : > { %2189 = vmatprep.mubr.msk.f32.mxu1 %vm2596_vm1, %v2579_v0 }
 0x1ed   : > { %v387_v29 = vpop.trf.xlu1 }
 0x1ee   : > { %2190 = vmatmul.mubr.msk.f32.gmra.mxu1 %vm192_vm0, %v387_v29  ;;  %v772_v42 = vpop.trf.xlu0 }
 0x1ef   : > { %2192 = vmatprep.mubr.msk.f32.mxu1 %vm2596_vm1, %v2579_v0 }
 0x1f1   : > { %v388_v31 = vpop.trf.xlu1 }
 0x1f2   : > { %2193 = vmatmul.mubr.msk.f32.gmra.mxu1 %vm192_vm0, %v388_v31  ;;  %v773_v45 = vpop.trf.xlu0 }
 0x1f3   : > { %2214 = vmatprep.mubr.msk.f32.mxu1 %vm2596_vm1, %v2579_v0 }
 0x1f6   : > { %2215 = vmatmul.mubr.msk.f32.vlgmr.msra.gmra.mxu1 %vm192_vm0, %v767_v27 }
 0x1f7   : > { %2217 = vmatprep.mubr.msk.f32.mxu1 %vm2596_vm1, %v2579_v0 }
 0x1fa   : > { %2218 = vmatmul.mubr.msk.f32.gmra.mxu1 %vm192_vm0, %v768_v30 }
 0x1fb   : > { %2220 = vmatprep.mubr.msk.f32.mxu1 %vm2596_vm1, %v2579_v0 }
 0x1fe   : > { %189 = vperm.xlu0 %2404, %v174_v34   ;;  %2221 = vmatmul.mubr.msk.f32.gmra.mxu1 %vm192_vm0, %v769_v32 }
 0x1ff   : > { %2223 = vmatprep.mubr.msk.f32.mxu1 %vm2596_vm1, %v2579_v0 }
 0x202   : > { %2224 = vmatmul.mubr.msk.f32.gmra.mxu1 %vm192_vm0, %v770_v33 }
 0x203   : > { %2226 = vmatprep.mubr.msk.f32.mxu1 %vm2596_vm1, %v2579_v0 }
 0x205   : > { %v1172_v41 = vpop.permute.xlu1 %1171 }
 0x206   : > { %v1200_v43 = vsel %vm358_vm6, %v1197_v40, %v1172_v41  ;;  %2227 = vmatmul.mubr.msk.f32.gmra.mxu1 %vm192_vm0, %v771_v35  ;;  %v1589_v49 = vsel %vm354_vm5, %v1586_v48, %v1172_v41 }
 0x207   : > { %v1203_v44 = vsel %vm362_vm7, %v1200_v43, %v1181_v25  ;;  %2229 = vmatprep.mubr.msk.f32.mxu1 %vm2596_vm1, %v2579_v0  ;;  %v1592_v51 = vsel %vm358_vm6, %v1589_v49, %v1181_v25 }
 0x208   : > { %2253 = vmatpush3.msra.mxu1 %v1203_v44 }
 0x209   : > { %2292 = vmatprep.subr.mxu1 %v2579_v0 }
 0x20a   : > { %2230 = vmatmul.mubr.msk.f32.gmra.mxu1 %vm192_vm0, %v772_v42 }
 0x20b   : > { %2232 = vmatprep.mubr.msk.f32.mxu1 %vm2596_vm1, %v2579_v0 }
 0x20e   : > { %2233 = vmatmul.mubr.msk.f32.gmra.mxu1 %vm192_vm0, %v773_v45 }
 0x20f   : > { %2254 = vmatprep.mubr.msk.f32.mxu1 %vm2596_vm1, %v2579_v0 }
 0x211   : > { %v1573_v50 = vpop.permute.xlu0 %1572 }
 0x212   : > { %v1595_v53 = vsel %vm362_vm7, %v1592_v51, %v1573_v50 }
 0x238   : > { %v1221_v52 = vpop.trf.xlu1 }
 0x239   : > { %2255 = vmatmul.mubr.msk.f32.vlgmr.msra.gmra.mxu1 %vm192_vm0, %v1221_v52  ;;  %v1613_v57 = vpop.trf.xlu0 }
 0x23a   : > { %2293 = vmatpush3.msra.mxu1 %v1595_v53  ;;  %2257 = vmatprep.mubr.msk.f32.mxu1 %vm2596_vm1, %v2579_v0 }
 0x23c   : > { %v1222_v54 = vpop.trf.xlu1 }
 0x23d   : > { %2258 = vmatmul.mubr.msk.f32.gmra.mxu1 %vm192_vm0, %v1222_v54  ;;  %v1614_v60 = vpop.trf.xlu0 }
 0x23e   : > { %2260 = vmatprep.mubr.msk.f32.mxu1 %vm2596_vm1, %v2579_v0 }
 0x240   : > { %v1223_v55 = vpop.trf.xlu1 }
 0x241   : > { %2261 = vmatmul.mubr.msk.f32.gmra.mxu1 %vm192_vm0, %v1223_v55  ;;  %v1615_v62 = vpop.trf.xlu0 }
 0x242   : > { %2263 = vmatprep.mubr.msk.f32.mxu1 %vm2596_vm1, %v2579_v0 }
 0x244   : > { %v1224_v56 = vpop.trf.xlu1 }
 0x245   : > { %2264 = vmatmul.mubr.msk.f32.gmra.mxu1 %vm192_vm0, %v1224_v56  ;;  %v1616_v63 = vpop.trf.xlu0 }
 0x246   : > { %2266 = vmatprep.mubr.msk.f32.mxu1 %vm2596_vm1, %v2579_v0 }
 0x248   : > { %v1225_v58 = vpop.trf.xlu1 }
 0x249   : > { %2267 = vmatmul.mubr.msk.f32.gmra.mxu1 %vm192_vm0, %v1225_v58  ;;  %v1617_v1 = vpop.trf.xlu0 }
 0x24a   : > { %2269 = vmatprep.mubr.msk.f32.mxu1 %vm2596_vm1, %v2579_v0 }
 0x24c   : > { %v1226_v59 = vpop.trf.xlu1 }
 0x24d   : > { %2270 = vmatmul.mubr.msk.f32.gmra.mxu1 %vm192_vm0, %v1226_v59  ;;  %v1618_v2 = vpop.trf.xlu0 }
 0x24e   : > { %2272 = vmatprep.mubr.msk.f32.mxu1 %vm2596_vm1, %v2579_v0 }
 0x250   : > { %v1227_v61 = vpop.trf.xlu1 }
 0x251   : > { %2273 = vmatmul.mubr.msk.f32.gmra.mxu1 %vm192_vm0, %v1227_v61  ;;  %v1619_v3 = vpop.trf.xlu0 }
 0x252   : > { %2294 = vmatprep.mubr.msk.f32.mxu1 %vm2596_vm1, %v2579_v0 }
 0x255   : > { %2295 = vmatmul.mubr.msk.f32.vlgmr.msra.gmra.mxu1 %vm192_vm0, %v1613_v57 }
 0x256   : > { %2297 = vmatprep.mubr.msk.f32.mxu1 %vm2596_vm1, %v2579_v0 }
 0x259   : > { %2298 = vmatmul.mubr.msk.f32.gmra.mxu1 %vm192_vm0, %v1614_v60 }
 0x25a   : > { %2300 = vmatprep.mubr.msk.f32.mxu1 %vm2596_vm1, %v2579_v0 }
 0x25d   : > { %2301 = vmatmul.mubr.msk.f32.gmra.mxu1 %vm192_vm0, %v1615_v62 }
 0x25e   : > { %2303 = vmatprep.mubr.msk.f32.mxu1 %vm2596_vm1, %v2579_v0 }
 0x261   : > { %2304 = vmatmul.mubr.msk.f32.gmra.mxu1 %vm192_vm0, %v1616_v63 }
 0x262   : > { %2306 = vmatprep.mubr.msk.f32.mxu1 %vm2596_vm1, %v2579_v0 }
 0x265   : > { %2307 = vmatmul.mubr.msk.f32.gmra.mxu1 %vm192_vm0, %v1617_v1 }
 0x266   : > { %2309 = vmatprep.mubr.msk.f32.mxu1 %vm2596_vm1, %v2579_v0 }
 0x269   : > { %2310 = vmatmul.mubr.msk.f32.gmra.mxu1 %vm192_vm0, %v1618_v2 }
 0x26a   : > { %2312 = vmatprep.mubr.msk.f32.mxu1 %vm2596_vm1, %v2579_v0 }
 0x26d   : > { %2313 = vmatmul.mubr.msk.f32.gmra.mxu1 %vm192_vm0, %v1619_v3  ;;  %vm722_vm0 = vcmask 745120  }
 0x279   : > { %v2908_v5 = vpop.permute.xlu0 %189 }
 0x27a   : > { %v2911_v6 = vadd.f32 %v280_v4, %v2908_v5 }
 0x27c   : > { %292 = vrot.lane.b32.xlu0 %v2911_v6, %s2582_s11  ;;  %301 = vrot.lane.b32.xlu1 %v2911_v6, %s2584_s19  ;;  %s2598_s19 = smov 7  }
 0x280   : > { %319 = vrot.lane.b32.xlu0 %v2911_v6, %s2586_s24  ;;  %310 = vrot.lane.b32.xlu1 %v2911_v6, %s2581_s10  ;;  %s161_s10 = sand.u32 1, %s2569_s13   ;;  %s2599_s24 = smov 14  }
 0x281   : > { %s2035_s11 = sshll.u32 %s161_s10, 4 }
 0x284   : > { %328 = vrot.lane.b32.xlu0 %v2911_v6, %s2583_s17  ;;  %1124 = vrot.lane.b32.xlu1 %v2911_v6, %s2587_s25  ;;  %s2597_s17 = smov 28   ;;  %s2600_s25 = smov 21  }
 0x288   : > { %337 = vrot.lane.b32.xlu0 %v2911_v6, %s2588_s26  ;;  %s2601_s26 = smov 35  }
 0x28c   : > { %728 = vrot.lane.b32.xlu0 %v2911_v6, %s2585_s20  ;;  %s3351_s20 = scalar_lea.vmem [#allocation2], %s2035_s11  ;;  %s2107_s11 = sshll.u32 %s2654_s16, 8 }
 0x28d   : > { %s2612_s16 = smov [#allocation2]  }
 0x290   : > { %1115 = vrot.lane.b32.xlu0 %v2911_v6, %s2590_s28  ;;  %s2603_s28 = smov 49  }
 0x29a   : > { %v2931_v7 = vpop.f32.mrf.mxu1 }
 0x29b   : > { %v520_v13 = vsel %vm519_vm9, %v2931_v7, -inf }
 0x29c   : > { %v2176_v8 = vpop.f32.mrf.mxu1 }
 0x29e   : > { %v2933_v9 = vpop.f32.mrf.mxu1 }
 0x29f   : > { %v523_v16 = vsel %vm519_vm9, %v2933_v9, -inf }
 0x2a0   : > { %v2179_v10 = vpop.f32.mrf.mxu1 }
 0x2a2   : > { %v2935_v11 = vpop.f32.mrf.mxu1 }
 0x2a3   : > { %v526_v19 = vsel %vm519_vm9, %v2935_v11, -inf }
 0x2a4   : > { %v2182_v12 = vpop.f32.mrf.mxu1 }
 0x2a6   : > { %v2939_v14 = vpop.f32.mrf.mxu1 }
 0x2a7   : > { %v529_v23 = vsel %vm519_vm9, %v2939_v14, -inf }
 0x2a8   : > { %521 = vmax.xlane.f32.xlu1 %v520_v13  ;;  %v2185_v15 = vpop.f32.mrf.mxu1 }
 0x2aa   : > { %v2943_v17 = vpop.f32.mrf.mxu1 }
 0x2ab   : > { %v532_v26 = vsel %vm519_vm9, %v2943_v17, -inf }
 0x2ac   : > { %524 = vmax.xlane.f32.xlu1 %v523_v16  ;;  %v2188_v18 = vpop.f32.mrf.mxu1 }
 0x2ae   : > { %v2947_v20 = vpop.f32.mrf.mxu1 }
 0x2af   : > { %v535_v21 = vsel %vm519_vm9, %v2947_v20, -inf }
 0x2b0   : > { %527 = vmax.xlane.f32.xlu1 %v526_v19  ;;  %536 = vmax.xlane.f32.xlu0 %v535_v21  ;;  %v2191_v22 = vpop.f32.mrf.mxu1 }
 0x2b2   : > { %v2953_v24 = vpop.f32.mrf.mxu1 }
 0x2b3   : > { %v539_v30 = vsel %vm538_vm10, %v2953_v24, -inf }
 0x2b4   : > { %530 = vmax.xlane.f32.xlu1 %v529_v23  ;;  %v2194_v25 = vpop.f32.mrf.mxu1 }
 0x2b6   : > { %v2957_v27 = vpop.f32.mrf.mxu1 }
 0x2b7   : > { %v904_v28 = vsel %vm519_vm9, %v2957_v27, -inf }
 0x2b8   : > { %533 = vmax.xlane.f32.xlu1 %v532_v26  ;;  %905 = vmax.xlane.f32.xlu0 %v904_v28  ;;  %v2216_v29 = vpop.f32.mrf.mxu1 }
 0x2ba   : > { %v2963_v31 = vpop.f32.mrf.mxu1 }
 0x2bb   : > { %v907_v33 = vsel %vm519_vm9, %v2963_v31, -inf }
 0x2bc   : > { %540 = vmax.xlane.f32.xlu1 %v539_v30  ;;  %v2219_v32 = vpop.f32.mrf.mxu1 }
 0x2be   : > { %v2967_v34 = vpop.f32.mrf.mxu1 }
 0x2bf   : > { %v910_v35 = vsel %vm519_vm9, %v2967_v34, -inf }
 0x2c0   : > { %908 = vmax.xlane.f32.xlu1 %v907_v33  ;;  %911 = vmax.xlane.f32.xlu0 %v910_v35  ;;  %v2222_v36 = vpop.f32.mrf.mxu1 }
 0x2c2   : > { %v2971_v37 = vpop.f32.mrf.mxu1 }
 0x2c3   : > { %v913_v38 = vsel %vm519_vm9, %v2971_v37, -inf }
 0x2c4   : > { %914 = vmax.xlane.f32.xlu1 %v913_v38  ;;  %v2225_v39 = vpop.f32.mrf.mxu1 }
 0x2c6   : > { %v2975_v40 = vpop.f32.mrf.mxu1 }
 0x2c7   : > { %v916_v41 = vsel %vm519_vm9, %v2975_v40, -inf }
 0x2c8   : > { %917 = vmax.xlane.f32.xlu1 %v916_v41  ;;  %v2228_v42 = vpop.f32.mrf.mxu1 }
 0x2ca   : > { %v2979_v43 = vpop.f32.mrf.mxu1 }
 0x2cb   : > { %v919_v44 = vsel %vm519_vm9, %v2979_v43, -inf }
 0x2cc   : > { %920 = vmax.xlane.f32.xlu1 %v919_v44  ;;  %v2231_v45 = vpop.f32.mrf.mxu1 }
 0x2ce   : > { %v2983_v46 = vpop.f32.mrf.mxu1 }
 0x2cf   : > { %v922_v47 = vsel %vm538_vm10, %v2983_v46, -inf }
 0x2d0   : > { %923 = vmax.xlane.f32.xlu1 %v922_v47  ;;  %v2234_v48 = vpop.f32.mrf.mxu1 }
 0x2ee   : > { %v293_v49 = vpop.permute.xlu0 %292  ;;  %v302_v50 = vpop.permute.xlu1 %301 }
 0x2ef   : > { %v345_v51 = vsel %vm342_vm2, %v2911_v6, %v293_v49  ;;  %v735_v53 = vsel %vm342_vm2, %v293_v49, %v302_v50 }
 0x2f0   : > { %v349_v52 = vsel %vm346_vm3, %v345_v51, %v302_v50 }
 0x2f2   : > { %v320_v54 = vpop.permute.xlu0 %319  ;;  %v311_v55 = vpop.permute.xlu1 %310 }
 0x2f3   : > { %v353_v56 = vsel %vm350_vm4, %v349_v52, %v311_v55  ;;  %v738_v57 = vsel %vm346_vm3, %v735_v53, %v311_v55 }
 0x2f4   : > { %v357_v58 = vsel %vm354_vm5, %v353_v56, %v320_v54  ;;  %v741_v59 = vsel %vm350_vm4, %v738_v57, %v320_v54 }
 0x2f6   : > { %v329_v60 = vpop.permute.xlu0 %328 }
 0x2f7   : > { %v361_v61 = vsel %vm358_vm6, %v357_v58, %v329_v60  ;;  %v744_v62 = vsel %vm354_vm5, %v741_v59, %v329_v60  ;;  %v3058_v60 = vpop.permute.xlu1 %1124 }
 0x2f9   : > { %v2997_v63 = vpop.f32.mrf.mxu1 }
 0x2fa   : > { %v338_v1 = vpop.permute.xlu0 %337  ;;  %v1358_v2 = vsel %vm519_vm9, %v2997_v63, -inf }
 0x2fb   : > { %v3002_v3 = vsel %vm362_vm7, %v361_v61, %v338_v1  ;;  %v747_v4 = vsel %vm358_vm6, %v744_v62, %v338_v1  ;;  %1359 = vmax.xlane.f32.xlu1 %v1358_v2  ;;  %v2256_v8 = vpop.f32.mrf.mxu1 }
 0x2fd   : > { %v3005_v10 = vpop.f32.mrf.mxu1 }
 0x2fe   : > { %v729_v12 = vpop.permute.xlu0 %728  ;;  %v1361_v13 = vsel %vm519_vm9, %v3005_v10, -inf }
 0x2ff   : > { %v3010_v15 = vsel %vm362_vm7, %v747_v4, %v729_v12  ;;  %1362 = vmax.xlane.f32.xlu1 %v1361_v13  ;;  %v2259_v16 = vpop.f32.mrf.mxu1 }
 0x301   : > { %v3012_v18 = vpop.f32.mrf.mxu1 }
 0x302   : > { %v1364_v19 = vsel %vm519_vm9, %v3012_v18, -inf  ;;  %v3065_v8 = vpop.permute.xlu0 %1115 }
 0x303   : > { %1365 = vmax.xlane.f32.xlu1 %v1364_v19  ;;  %v2262_v21 = vpop.f32.mrf.mxu1 }
 0x305   : > { %v3016_v22 = vpop.f32.mrf.mxu1 }
 0x306   : > { %v1367_v23 = vsel %vm519_vm9, %v3016_v22, -inf }
 0x307   : > { %1368 = vmax.xlane.f32.xlu0 %v1367_v23  ;;  %v2265_v25 = vpop.f32.mrf.mxu1 }
 0x309   : > { %v3020_v26 = vpop.f32.mrf.mxu1 }
 0x30a   : > { %v1370_v28 = vsel %vm519_vm9, %v3020_v26, -inf }
 0x30b   : > { %1371 = vmax.xlane.f32.xlu1 %v1370_v28  ;;  %v2268_v29 = vpop.f32.mrf.mxu1 }
 0x30d   : > { %v3024_v30 = vpop.f32.mrf.mxu1 }
 0x30e   : > { %v1373_v32 = vsel %vm519_vm9, %v3024_v30, -inf }
 0x30f   : > { %1374 = vmax.xlane.f32.xlu0 %v1373_v32  ;;  %v2271_v33 = vpop.f32.mrf.mxu1 }
 0x311   : > { %v3028_v35 = vpop.f32.mrf.mxu1 }
 0x312   : > { %v1376_v36 = vsel %vm538_vm10, %v3028_v35, -inf }
 0x313   : > { %1377 = vmax.xlane.f32.xlu1 %v1376_v36  ;;  %v2274_v38 = vpop.f32.mrf.mxu1 }
 0x315   : > { %v3032_v39 = vpop.f32.mrf.mxu1 }
 0x316   : > { %v1750_v41 = vsel %vm519_vm9, %v3032_v39, -inf }
 0x317   : > { %1751 = vmax.xlane.f32.xlu1 %v1750_v41  ;;  %v2296_v42 = vpop.f32.mrf.mxu1 }
 0x319   : > { %v3036_v44 = vpop.f32.mrf.mxu1 }
 0x31a   : > { %v1753_v45 = vsel %vm519_vm9, %v3036_v44, -inf }
 0x31b   : > { %1754 = vmax.xlane.f32.xlu1 %v1753_v45  ;;  %v2299_v47 = vpop.f32.mrf.mxu1 }
 0x31d   : > { %v3040_v48 = vpop.f32.mrf.mxu1 }
 0x31e   : > { %v1756_v49 = vsel %vm519_vm9, %v3040_v48, -inf }
 0x31f   : > { %1757 = vmax.xlane.f32.xlu1 %v1756_v49  ;;  %v2302_v50 = vpop.f32.mrf.mxu1 }
 0x321   : > { %v3044_v51 = vpop.f32.mrf.mxu1 }
 0x322   : > { %v1759_v52 = vsel %vm519_vm9, %v3044_v51, -inf }
 0x323   : > { %1760 = vmax.xlane.f32.xlu1 %v1759_v52  ;;  %v2305_v53 = vpop.f32.mrf.mxu1 }
 0x325   : > { %1140 = vrot.lane.b32.xlu0 %v2911_v6, %s2589_s27  ;;  %v3050_v54 = vpop.f32.mrf.mxu1 }
 0x326   : > { %v1762_v55 = vsel %vm519_vm9, %v3050_v54, -inf }
 0x327   : > { %1763 = vmax.xlane.f32.xlu1 %v1762_v55  ;;  %v2308_v56 = vpop.f32.mrf.mxu1 }
 0x329   : > { %v3054_v57 = vpop.f32.mrf.mxu1 }
 0x32a   : > { %v1765_v58 = vsel %vm519_vm9, %v3054_v57, -inf }
 0x32b   : > { %1766 = vmax.xlane.f32.xlu1 %v1765_v58  ;;  %v2311_v59 = vpop.f32.mrf.mxu1 }
 0x32d   : > { %v3060_v61 = vpop.f32.mrf.mxu1 }
 0x32e   : > { %v1768_v6 = vsel %vm538_vm10, %v3060_v61, -inf }
 0x32f   : > { %1769 = vmax.xlane.f32.xlu1 %v1768_v6  ;;  %v2314_v62 = vpop.f32.mrf.mxu1 }
 0x331   : > { %v522_v1 = vpop.xlane.xlu1 %521 }
 0x332   : > { %v542_v2 = vsub.f32 %v2931_v7, %v522_v1 }
 0x334   : > { %v549_v4 = vmul.f32 1.442695, %v542_v2 }
 0x335   : > { %v525_v12 = vpop.xlane.xlu1 %524 }
 0x336   : > { %2405 = vpow2.f32 %v549_v4  ;;  %v543_v13 = vsub.f32 %v2933_v9, %v525_v12 }
 0x338   : > { %v551_v16 = vmul.f32 1.442695, %v543_v13 }
 0x339   : > { %v537_v19 = vpop.xlane.xlu0 %536  ;;  %v528_v21 = vpop.xlane.xlu1 %527 }
 0x33a   : > { %2407 = vpow2.f32 %v551_v16  ;;  %v547_v23 = vsub.f32 %v2947_v20, %v537_v19  ;;  %v544_v25 = vsub.f32 %v2935_v11, %v528_v21 }
 0x33c   : > { %v559_v28 = vmul.f32 1.442695, %v547_v23  ;;  %v553_v29 = vmul.f32 1.442695, %v544_v25 }
 0x33d   : > { %v531_v32 = vpop.xlane.xlu1 %530 }
 0x33e   : > { %2409 = vpow2.f32 %v559_v28  ;;  %v545_v7 = vsub.f32 %v2939_v14, %v531_v32 }
 0x33f   : > { %2411 = vpow2.f32 %v553_v29 }
 0x340   : > { %v555_v33 = vmul.f32 1.442695, %v545_v7 }
 0x341   : > { %v534_v36 = vpop.xlane.xlu1 %533  ;;  %v906_v38 = vpop.xlane.xlu0 %905 }
 0x342   : > { %2413 = vpow2.f32 %v555_v33  ;;  %v546_v9 = vsub.f32 %v2943_v17, %v534_v36  ;;  %v925_v11 = vsub.f32 %v2957_v27, %v906_v38 }
 0x343   : > { %v3072_v41 = vpop.eup %2405 }
 0x344   : > { %v557_v42 = vmul.f32 1.442695, %v546_v9  ;;  %v563_v20 = vsel %vm519_vm9, %v3072_v41, 0.0  ;;  %v932_v17 = vmul.f32 1.442695, %v925_v11 }
 0x345   : > { %564 = vadd.xlane.f32.xlu1 %v563_v20  ;;  %v541_v45 = vpop.xlane.xlu1 %540 }
 0x346   : > { %v548_v47 = vsub.f32 %v2953_v24, %v541_v45  ;;  %2415 = vpow2.f32 %v557_v42 }
 0x347   : > { %v3078_v14 = vpop.eup %2407 }
 0x348   : > { %v561_v49 = vmul.f32 1.442695, %v548_v47  ;;  %v566_v50 = vsel %vm519_vm9, %v3078_v14, 0.0 }
 0x349   : > { %v912_v52 = vpop.xlane.xlu0 %911  ;;  %567 = vadd.xlane.f32.xlu0 %v566_v50  ;;  %v909_v53 = vpop.xlane.xlu1 %908 }
 0x34a   : > { %2417 = vpow2.f32 %v561_v49  ;;  %v927_v55 = vsub.f32 %v2967_v34, %v912_v52  ;;  %v926_v27 = vsub.f32 %v2963_v31, %v909_v53  ;;  %v282_v52 = vpop.f32.mrf.mxu0 }
 0x34b   : > { %v3084_v56 = vpop.eup %2409  ;;  %2419 = vpow2.f32 %v932_v17  ;;  %v3137_v53 = vadd.f32 %v282_v52, %v2908_v5 }
 0x34c   : > { %v3086_v58 = vpop.eup %2411  ;;  %v936_v24 = vmul.f32 1.442695, %v927_v55  ;;  %v578_v59 = vsel %vm519_vm9, %v3084_v56, 0.0  ;;  %v934_v6 = vmul.f32 1.442695, %v926_v27 }
 0x34d   : > { %579 = vadd.xlane.f32.xlu0 %v578_v59  ;;  %v569_v62 = vsel %vm519_vm9, %v3086_v58, 0.0  ;;  %v915_v1 = vpop.xlane.xlu1 %914 }
 0x34e   : > { %2421 = vpow2.f32 %v936_v24  ;;  %570 = vadd.xlane.f32.xlu1 %v569_v62  ;;  %v928_v34 = vsub.f32 %v2971_v37, %v915_v1 }
 0x34f   : > { %v3093_v31 = vpop.eup %2413  ;;  %2423 = vpow2.f32 %v934_v6 }
 0x350   : > { %v572_v2 = vsel %vm519_vm9, %v3093_v31, 0.0  ;;  %v938_v4 = vmul.f32 1.442695, %v928_v34 }
 0x351   : > { %v918_v12 = vpop.xlane.xlu1 %917 }
 0x352   : > { %573 = vadd.xlane.f32.xlu1 %v572_v2  ;;  %v929_v13 = vsub.f32 %v2975_v40, %v918_v12  ;;  %2425 = vpow2.f32 %v938_v4 }
 0x353   : > { %v3098_v16 = vpop.eup %2415 }
 0x354   : > { %v940_v19 = vmul.f32 1.442695, %v929_v13  ;;  %v575_v21 = vsel %vm519_vm9, %v3098_v16, 0.0 }
 0x355   : > { %v921_v23 = vpop.xlane.xlu1 %920 }
 0x356   : > { %2427 = vpow2.f32 %v940_v19  ;;  %576 = vadd.xlane.f32.xlu1 %v575_v21  ;;  %v930_v37 = vsub.f32 %v2979_v43, %v921_v23 }
 0x357   : > { %v3103_v25 = vpop.eup %2417 }
 0x358   : > { %v942_v28 = vmul.f32 1.442695, %v930_v37  ;;  %v581_v29 = vsel %vm538_vm10, %v3103_v25, 0.0  ;;  %v3107_v40 = vpop.eup %2419 }
 0x359   : > { %v924_v32 = vpop.xlane.xlu1 %923  ;;  %v946_v43 = vsel %vm519_vm9, %v3107_v40, 0.0 }
 0x35a   : > { %2429 = vpow2.f32 %v942_v28  ;;  %582 = vadd.xlane.f32.xlu1 %v581_v29  ;;  %v931_v7 = vsub.f32 %v2983_v46, %v924_v32 }
 0x35b   : > { %v3110_v33 = vpop.eup %2421 }
 0x35c   : > { %v944_v36 = vmul.f32 1.442695, %v931_v7  ;;  %v952_v38 = vsel %vm519_vm9, %v3110_v33, 0.0  ;;  %v3116_v9 = vpop.eup %2423 }
 0x35d   : > { %953 = vadd.xlane.f32.xlu0 %v952_v38  ;;  %v949_v42 = vsel %vm519_vm9, %v3116_v9, 0.0 }
 0x35e   : > { %2431 = vpow2.f32 %v944_v36  ;;  %947 = vadd.xlane.f32.xlu1 %v946_v43 }
 0x35f   : > { %v3120_v20 = vpop.eup %2425 }
 0x360   : > { %v955_v45 = vsel %vm519_vm9, %v3120_v20, 0.0 }
 0x362   : > { %950 = vadd.xlane.f32.xlu1 %v949_v42 }
 0x363   : > { %v3122_v46 = vpop.eup %2427 }
 0x364   : > { %v958_v11 = vsel %vm519_vm9, %v3122_v46, 0.0 }
 0x365   : > { %959 = vadd.xlane.f32.xlu0 %v958_v11 }
 0x366   : > { %956 = vadd.xlane.f32.xlu1 %v955_v45 }
 0x367   : > { %v3128_v47 = vpop.eup %2429 }
 0x368   : > { %v961_v49 = vsel %vm519_vm9, %v3128_v47, 0.0 }
 0x36a   : > { %962 = vadd.xlane.f32.xlu1 %v961_v49 }
 0x36b   : > { %v3132_v50 = vpop.eup %2431 }
 0x36c   : > { %v964_v17 = vsel %vm538_vm10, %v3132_v50, 0.0 }
 0x36d   : > { %965 = vadd.xlane.f32.xlu0 %v964_v17 }
 0x383   : > { %1142 = vrot.lane.b32.xlu0 %v3137_v53, %s2589_s27  ;;  %s2602_s27 = smov 42  }
 0x384   : > { %v1360_v55 = vpop.xlane.xlu1 %1359 }
 0x385   : > { %v1379_v27 = vsub.f32 %v2997_v63, %v1360_v55 }
 0x387   : > { %v1386_v24 = vmul.f32 1.442695, %v1379_v27 }
 0x388   : > { %v1363_v59 = vpop.xlane.xlu1 %1362 }
 0x389   : > { %2433 = vpow2.f32 %v1386_v24  ;;  %v1380_v6 = vsub.f32 %v3005_v10, %v1363_v59 }
 0x38b   : > { %v1388_v62 = vmul.f32 1.442695, %v1380_v6 }
 0x38c   : > { %v1366_v1 = vpop.xlane.xlu1 %1365 }
 0x38d   : > { %v1381_v34 = vsub.f32 %v3012_v18, %v1366_v1  ;;  %2435 = vpow2.f32 %v1388_v62 }
 0x38f   : > { %v1390_v2 = vmul.f32 1.442695, %v1381_v34 }
 0x390   : > { %v1369_v4 = vpop.xlane.xlu0 %1368 }
 0x391   : > { %2437 = vpow2.f32 %v1390_v2  ;;  %v1382_v5 = vsub.f32 %v3016_v22, %v1369_v4 }
 0x393   : > { %v1392_v12 = vmul.f32 1.442695, %v1382_v5 }
 0x394   : > { %v1372_v13 = vpop.xlane.xlu1 %1371 }
 0x395   : > { %2439 = vpow2.f32 %v1392_v12  ;;  %v1383_v63 = vsub.f32 %v3020_v26, %v1372_v13 }
 0x396   : > { %v3146_v19 = vpop.eup %2433 }
 0x397   : > { %v1394_v21 = vmul.f32 1.442695, %v1383_v63  ;;  %v1400_v10 = vsel %vm519_vm9, %v3146_v19, 0.0 }
 0x398   : > { %v1375_v23 = vpop.xlane.xlu0 %1374  ;;  %1401 = vadd.xlane.f32.xlu1 %v1400_v10 }
 0x399   : > { %2441 = vpow2.f32 %v1394_v21  ;;  %v1384_v18 = vsub.f32 %v3024_v30, %v1375_v23 }
 0x39a   : > { %v3151_v29 = vpop.eup %2435 }
 0x39b   : > { %v1396_v37 = vmul.f32 1.442695, %v1384_v18  ;;  %v1403_v36 = vsel %vm519_vm9, %v3151_v29, 0.0 }
 0x39c   : > { %v1378_v28 = vpop.xlane.xlu1 %1377 }
 0x39d   : > { %2443 = vpow2.f32 %v1396_v37  ;;  %v1385_v22 = vsub.f32 %v3028_v35, %v1378_v28 }
 0x39e   : > { %v3154_v32 = vpop.eup %2437 }
 0x39f   : > { %v1398_v26 = vmul.f32 1.442695, %v1385_v22  ;;  %v1406_v7 = vsel %vm519_vm9, %v3154_v32, 0.0 }
 0x3a0   : > { %1407 = vadd.xlane.f32.xlu1 %v1406_v7  ;;  %v1752_v11 = vpop.xlane.xlu1 %1751 }
 0x3a1   : > { %2445 = vpow2.f32 %v1398_v26  ;;  %v1771_v6 = vsub.f32 %v3032_v39, %v1752_v11  ;;  %v3189_v39 = vpop.permute.xlu0 %1140 }
 0x3a2   : > { %v3160_v38 = vpop.eup %2439  ;;  %1404 = vadd.xlane.f32.xlu0 %v1403_v36 }
 0x3a3   : > { %v1409_v30 = vsel %vm519_vm9, %v3160_v38, 0.0  ;;  %v1778_v1 = vmul.f32 1.442695, %v1771_v6 }
 0x3a4   : > { %v1755_v52 = vpop.xlane.xlu1 %1754 }
 0x3a5   : > { %v1772_v62 = vsub.f32 %v3036_v44, %v1755_v52  ;;  %2447 = vpow2.f32 %v1778_v1 }
 0x3a6   : > { %v3164_v43 = vpop.eup %2441  ;;  %1410 = vadd.xlane.f32.xlu0 %v1409_v30 }
 0x3a7   : > { %v1412_v35 = vsel %vm519_vm9, %v3164_v43, 0.0  ;;  %v1780_v2 = vmul.f32 1.442695, %v1772_v62 }
 0x3a8   : > { %1413 = vadd.xlane.f32.xlu1 %v1412_v35  ;;  %v1758_v55 = vpop.xlane.xlu1 %1757 }
 0x3a9   : > { %v1773_v4 = vsub.f32 %v3040_v48, %v1758_v55  ;;  %2449 = vpow2.f32 %v1780_v2 }
 0x3aa   : > { %v3168_v42 = vpop.eup %2443 }
 0x3ab   : > { %v1415_v45 = vsel %vm519_vm9, %v3168_v42, 0.0  ;;  %v1782_v12 = vmul.f32 1.442695, %v1773_v4 }
 0x3ac   : > { %1416 = vadd.xlane.f32.xlu1 %v1415_v45  ;;  %v1761_v27 = vpop.xlane.xlu1 %1760 }
 0x3ad   : > { %v1774_v13 = vsub.f32 %v3044_v51, %v1761_v27  ;;  %2451 = vpow2.f32 %v1782_v12 }
 0x3ae   : > { %v3172_v49 = vpop.eup %2445 }
 0x3af   : > { %v1418_v17 = vsel %vm538_vm10, %v3172_v49, 0.0  ;;  %v1784_v21 = vmul.f32 1.442695, %v1774_v13 }
 0x3b0   : > { %1419 = vadd.xlane.f32.xlu0 %v1418_v17  ;;  %v1764_v24 = vpop.xlane.xlu1 %1763 }
 0x3b1   : > { %v1775_v10 = vsub.f32 %v3050_v54, %v1764_v24  ;;  %2453 = vpow2.f32 %v1784_v21 }
 0x3b2   : > { %v3192_v22 = vpop.eup %2447 }
 0x3b3   : > { %v1786_v18 = vmul.f32 1.442695, %v1775_v10 }
 0x3b4   : > { %v1767_v59 = vpop.xlane.xlu1 %1766 }
 0x3b5   : > { %v1776_v44 = vsub.f32 %v3054_v57, %v1767_v59  ;;  %2455 = vpow2.f32 %v1786_v18  ;;  %v1792_v57 = vsel %vm519_vm9, %v3192_v22, 0.0 }
 0x3b6   : > { %v3195_v26 = vpop.eup %2449 }
 0x3b7   : > { %v1788_v37 = vmul.f32 1.442695, %v1776_v44  ;;  %v1795_v30 = vsel %vm519_vm9, %v3195_v26, 0.0 }
 0x3b8   : > { %v1770_v34 = vpop.xlane.xlu1 %1769 }
 0x3b9   : > { %v1777_v51 = vsub.f32 %v3060_v61, %v1770_v34  ;;  %2457 = vpow2.f32 %v1788_v37 }
 0x3ba   : > { %v3201_v35 = vpop.eup %2451 }
 0x3bb   : > { %v1790_v36 = vmul.f32 1.442695, %v1777_v51  ;;  %v1798_v61 = vsel %vm519_vm9, %v3201_v35, 0.0 }
 0x3bd   : > { %1164 = vrot.lane.b32.xlu1 %v3137_v53, %s2591_s29  ;;  %s2604_s29 = smov 98  }
 0x3be   : > { %v3205_v11 = vpop.eup %2453 }
 0x3bf   : > { %v1801_v45 = vsel %vm519_vm9, %v3205_v11, 0.0 }
 0x3c1   : > { %1173 = vrot.lane.b32.xlu1 %v3137_v53, %s2595_s6  ;;  %s2608_s6 = smov 126  }
 0x3c2   : > { %v3209_v17 = vpop.eup %2455 }
 0x3c3   : > { %v1804_v24 = vsel %vm519_vm9, %v3209_v17, 0.0 }
 0x3c6   : > { %1155 = vrot.lane.b32.xlu0 %v3137_v53, %s2593_s4  ;;  %v3213_v27 = vpop.eup %2457  ;;  %s2606_s4 = smov 105  }
 0x3c7   : > { %v1807_v2 = vsel %vm519_vm9, %v3213_v27, 0.0 }
 0x3ce   : > { %v3185_v5 = vpop.xlane.xlu1 %564 }
 0x3d2   : > { %v568_v48 = vpop.xlane.xlu0 %567 }
 0x3d6   : > { %v580_v7 = vpop.xlane.xlu0 %579 }
 0x3d7   : > { %v571_v63 = vpop.xlane.xlu1 %570 }
 0x3db   : > { %v574_v23 = vpop.xlane.xlu1 %573 }
 0x3df   : > { %v577_v28 = vpop.xlane.xlu1 %576 }
 0x3e3   : > { %v583_v54 = vpop.xlane.xlu1 %582 }
 0x3e4   : > { %2459 = vrcp.f32 %v583_v54 }
 0x3e5   : > { %1793 = vadd.xlane.f32.xlu0 %v1792_v57  ;;  %1796 = vadd.xlane.f32.xlu1 %v1795_v30  ;;  %2461 = vrcp.f32 %v580_v7 }
 0x3e6   : > { %2463 = vpow2.f32 %v1790_v36  ;;  %v954_v55 = vpop.xlane.xlu0 %953 }
 0x3e7   : > { %2465 = vrcp.f32 %v577_v28  ;;  %v3211_v52 = vpop.xlane.xlu1 %947 }
 0x3e8   : > { %2467 = vrcp.f32 %v574_v23 }
 0x3e9   : > { %1799 = vadd.xlane.f32.xlu1 %v1798_v61  ;;  %2469 = vrcp.f32 %v571_v63 }
 0x3ea   : > { %2471 = vrcp.f32 %v568_v48 }
 0x3eb   : > { %v951_v34 = vpop.xlane.xlu1 %950  ;;  %2473 = vrcp.f32 %v3185_v5 }
 0x3ed   : > { %1802 = vadd.xlane.f32.xlu1 %v1801_v45 }
 0x3ee   : > { %v960_v6 = vpop.xlane.xlu0 %959 }
 0x3ef   : > { %v957_v21 = vpop.xlane.xlu1 %956 }
 0x3f1   : > { %v2460_v59 = vpop.eup %2459  ;;  %1805 = vadd.xlane.f32.xlu1 %v1804_v24 }
 0x3f2   : > { %v597_v62 = vmul.f32 %v2460_v59, %v3103_v25  ;;  %v2462_v1 = vpop.eup %2461 }
 0x3f3   : > { %v3221_v4 = vpop.eup %2463  ;;  %v596_v13 = vmul.f32 %v2462_v1, %v3084_v56  ;;  %v1189_v56 = vsel %vm342_vm2, %v3065_v8, %v3058_v60 }
 0x3f4   : > { %2196 = vmatpush3.xpose.msk.msra.mxu0 %vm519_vm9, %v597_v62  ;;  %v2466_v63 = vpop.eup %2465  ;;  %v1810_v25 = vsel %vm538_vm10, %v3221_v4, 0.0  ;;  %vm1538_vm10 = vcmask 974720  }
 0x3f5   : > { %1808 = vadd.xlane.f32.xlu1 %v1807_v2  ;;  %2197 = vmatprep.subr.mxu0 %v2579_v0  ;;  %v595_v44 = vmul.f32 %v2466_v63, %v3098_v16  ;;  %v2468_v23 = vpop.eup %2467  ;;  %v963_v16 = vpop.xlane.xlu1 %962 }
 0x3f6   : > { %v966_v12 = vpop.xlane.xlu0 %965  ;;  %v594_v5 = vmul.f32 %v2468_v23, %v3093_v31  ;;  %v2470_v37 = vpop.eup %2469 }
 0x3f7   : > { %2475 = vrcp.f32 %v966_v12  ;;  %v593_v8 = vmul.f32 %v2470_v37, %v3086_v58  ;;  %v2472_v28 = vpop.eup %2471 }
 0x3f8   : > { %2198 = vmatpush3.xpose.msk.msra.mxu0 %vm519_vm9, %v596_v13  ;;  %2477 = vrcp.f32 %v963_v16  ;;  %v592_v51 = vmul.f32 %v2472_v28, %v3078_v14  ;;  %v2474_v7 = vpop.eup %2473 }
 0x3f9   : > { %1811 = vadd.xlane.f32.xlu1 %v1810_v25  ;;  %2199 = vmatprep.subr.mxu0 %v2579_v0  ;;  %2479 = vrcp.f32 %v960_v6  ;;  %v591_v31 = vmul.f32 %v2474_v7, %v3072_v41 }
 0x3fa   : > { %v1143_v10 = vpop.permute.xlu0 %1142  ;;  %2481 = vrcp.f32 %v957_v21 }
 0x3fb   : > { %v1147_v18 = vsel %vm1144_vm8, %v3189_v39, %v1143_v10  ;;  %2483 = vrcp.f32 %v954_v55  ;;  %vm1533_vm8 = vcmask 859920  }
 0x3fc   : > { %2200 = vmatpush3.xpose.msk.msra.mxu0 %vm519_vm9, %v595_v44  ;;  %v3238_v48 = vsel %vm346_vm3, %v1189_v56, %v1147_v18  ;;  %2485 = vrcp.f32 %v951_v34 }
 0x3fd   : > { %2201 = vmatprep.subr.mxu0 %v2579_v0  ;;  %2487 = vrcp.f32 %v3211_v52 }
 0x400   : > { %2202 = vmatpush3.xpose.msk.msra.mxu0 %vm519_vm9, %v594_v5 }
 0x401   : > { %2203 = vmatprep.subr.mxu0 %v2579_v0 }
 0x404   : > { %2204 = vmatpush3.xpose.msk.msra.mxu0 %vm519_vm9, %v593_v8  ;;  %v2476_v58 = vpop.eup %2475 }
 0x405   : > { %2205 = vmatprep.subr.mxu0 %v2579_v0  ;;  %v980_v14 = vmul.f32 %v2476_v58, %v3132_v50  ;;  %v2478_v54 = vpop.eup %2477 }
 0x406   : > { %v979_v41 = vmul.f32 %v2478_v54, %v3128_v47  ;;  %v2480_v36 = vpop.eup %2479 }
 0x407   : > { %v978_v50 = vmul.f32 %v2480_v36, %v3122_v46 }
 0x408   : > { %2206 = vmatpush3.xpose.msk.msra.mxu0 %vm519_vm9, %v592_v51 }
 0x409   : > { %2207 = vmatprep.subr.mxu0 %v2579_v0 }
 0x40a   : > { %1182 = vrot.lane.b32.xlu1 %v3137_v53, %s2592_s30  ;;  %s2605_s30 = smov 112  }
 0x40c   : > { %2208 = vmatpush3.xpose.msk.msra.mxu0 %vm519_vm9, %v591_v31 }
 0x40d   : > { %2235 = vmatprep.subr.mxu0 %v2579_v0 }
 0x40e   : > { %1574 = vrot.lane.b32.xlu1 %v3137_v53, %s2594_s5  ;;  %s2607_s5 = smov 119  }
 0x40f   : > { %2210 = vmatmul.mubr.msk.f32.vlgmr.msra.gmra.mxu0 %vm519_vm9, %v3002_v3  ;;  %v2482_v3 = vpop.eup %2481 }
 0x410   : > { %2236 = vmatpush3.xpose.msk.msra.mxu0 %vm519_vm9, %v980_v14  ;;  %2249 = vmatprep.mubr.msk.f32.mxu0 %vm2596_vm1, %v2579_v0  ;;  %v977_v53 = vmul.f32 %v2482_v3, %v3120_v20  ;;  %v2484_v57 = vpop.eup %2483 }
 0x411   : > { %2237 = vmatprep.subr.mxu0 %v2579_v0  ;;  %v976_v47 = vmul.f32 %v2484_v57, %v3110_v33  ;;  %v2486_v30 = vpop.eup %2485 }
 0x412   : > { %v975_v46 = vmul.f32 %v2486_v30, %v3116_v9  ;;  %v2488_v61 = vpop.eup %2487 }
 0x413   : > { %v974_v20 = vmul.f32 %v2488_v61, %v3107_v40  ;;  %v1581_v40 = vsel %vm342_vm2, %v3058_v60, %v3189_v39 }
 0x414   : > { %2238 = vmatpush3.xpose.msk.msra.mxu0 %vm519_vm9, %v979_v41 }
 0x415   : > { %2239 = vmatprep.subr.mxu0 %v2579_v0 }
 0x418   : > { %2240 = vmatpush3.xpose.msk.msra.mxu0 %vm519_vm9, %v978_v50 }
 0x419   : > { %2241 = vmatprep.subr.mxu0 %v2579_v0 }
 0x41c   : > { %2242 = vmatpush3.xpose.msk.msra.mxu0 %vm519_vm9, %v977_v53 }
 0x41d   : > { %2243 = vmatprep.subr.mxu0 %v2579_v0 }
 0x420   : > { %2244 = vmatpush3.xpose.msk.msra.mxu0 %vm519_vm9, %v976_v47 }
 0x421   : > { %2245 = vmatprep.subr.mxu0 %v2579_v0  ;;  %v1402_v45 = vpop.xlane.xlu1 %1401 }
 0x424   : > { %2246 = vmatpush3.xpose.msk.msra.mxu0 %vm519_vm9, %v975_v46 }
 0x425   : > { %2247 = vmatprep.subr.mxu0 %v2579_v0 }
 0x428   : > { %2248 = vmatpush3.xpose.msk.msra.mxu0 %vm519_vm9, %v974_v20 }
 0x429   : > { %2275 = vmatprep.subr.mxu0 %v2579_v0  ;;  %v1408_v33 = vpop.xlane.xlu1 %1407 }
 0x42b   : > { %2250 = vmatmul.mubr.msk.f32.vlgmr.msra.gmra.mxu0 %vm519_vm9, %v3010_v15  ;;  %v1405_v9 = vpop.xlane.xlu0 %1404 }
 0x42c   : > { %2289 = vmatprep.mubr.msk.f32.mxu0 %vm2596_vm1, %v2579_v0 }
 0x42f   : > { %v1411_v55 = vpop.xlane.xlu0 %1410 }
 0x431   : > { %v1414_v52 = vpop.xlane.xlu1 %1413 }
 0x435   : > { %v1417_v24 = vpop.xlane.xlu1 %1416 }
 0x439   : > { %v1420_v59 = vpop.xlane.xlu0 %1419  ;;  %v1165_v6 = vpop.permute.xlu1 %1164 }
 0x43a   : > { %2489 = vrcp.f32 %v1420_v59 }
 0x43b   : > { %2491 = vrcp.f32 %v1417_v24 }
 0x43c   : > { %2493 = vrcp.f32 %v1414_v52 }
 0x43d   : > { %v1156_v62 = vpop.permute.xlu0 %1155  ;;  %v1174_v34 = vpop.permute.xlu1 %1173  ;;  %2495 = vrcp.f32 %v1411_v55 }
 0x43e   : > { %v1584_v1 = vsel %vm346_vm3, %v1581_v40, %v1156_v62  ;;  %2497 = vrcp.f32 %v1408_v33  ;;  %v1195_v16 = vsel %vm350_vm4, %v3238_v48, %v1156_v62  ;;  %vm1089_vm3 = vcmask 343320  }
 0x43f   : > { %v1587_v15 = vsel %vm350_vm4, %v1584_v1, %v1165_v6  ;;  %2499 = vrcp.f32 %v1405_v9  ;;  %v1198_v8 = vsel %vm354_vm5, %v1195_v16, %v1165_v6  ;;  %vm1094_vm4 = vcmask 458120  }
 0x440   : > { %v3293_v2 = vsel %vm354_vm5, %v1587_v15, %v1174_v34  ;;  %2501 = vrcp.f32 %v1402_v45  ;;  %v1201_v28 = vsel %vm358_vm6, %v1198_v8, %v1174_v34  ;;  %vm1099_vm5 = vcmask 572920  }
 0x447   : > { %v2490_v12 = vpop.eup %2489 }
 0x448   : > { %v1434_v13 = vmul.f32 %v2490_v12, %v3172_v49  ;;  %v2492_v63 = vpop.eup %2491 }
 0x449   : > { %v1433_v60 = vmul.f32 %v2492_v63, %v3168_v42  ;;  %v2494_v39 = vpop.eup %2493 }
 0x44a   : > { %2276 = vmatpush3.xpose.msk.msra.mxu0 %vm519_vm9, %v1434_v13  ;;  %v1432_v25 = vmul.f32 %v2494_v39, %v3164_v43  ;;  %v2496_v21 = vpop.eup %2495 }
 0x44b   : > { %2277 = vmatprep.subr.mxu0 %v2579_v0  ;;  %v1431_v49 = vmul.f32 %v2496_v21, %v3160_v38  ;;  %v2498_v10 = vpop.eup %2497 }
 0x44c   : > { %v1430_v42 = vmul.f32 %v2498_v10, %v3154_v32  ;;  %v2500_v44 = vpop.eup %2499 }
 0x44d   : > { %v1429_v43 = vmul.f32 %v2500_v44, %v3151_v29  ;;  %v2502_v23 = vpop.eup %2501 }
 0x44e   : > { %2278 = vmatpush3.xpose.msk.msra.mxu0 %vm519_vm9, %v1433_v60  ;;  %v1428_v38 = vmul.f32 %v2502_v23, %v3146_v19 }
 0x44f   : > { %2279 = vmatprep.subr.mxu0 %v2579_v0 }
 0x452   : > { %2280 = vmatpush3.xpose.msk.msra.mxu0 %vm519_vm9, %v1432_v25 }
 0x453   : > { %2281 = vmatprep.subr.mxu0 %v2579_v0 }
 0x456   : > { %2282 = vmatpush3.xpose.msk.msra.mxu0 %vm519_vm9, %v1431_v49 }
 0x457   : > { %2283 = vmatprep.subr.mxu0 %v2579_v0 }
 0x45a   : > { %2284 = vmatpush3.xpose.msk.msra.mxu0 %vm519_vm9, %v1430_v42 }
 0x45b   : > { %2285 = vmatprep.subr.mxu0 %v2579_v0 }
 0x45e   : > { %2286 = vmatpush3.xpose.msk.msra.mxu0 %vm519_vm9, %v1429_v43 }
 0x45f   : > { %2287 = vmatprep.subr.mxu0 %v2579_v0 }
 0x462   : > { %2288 = vmatpush3.xpose.msk.msra.mxu0 %vm519_vm9, %v1428_v38 }
 0x463   : > { %2315 = vmatprep.subr.mxu0 %v2579_v0 }
 0x46e   : > { %v1797_v56 = vpop.xlane.xlu1 %1796  ;;  %v1794_v54 = vpop.xlane.xlu0 %1793 }
 0x472   : > { %v1800_v32 = vpop.xlane.xlu1 %1799 }
 0x476   : > { %v1803_v18 = vpop.xlane.xlu1 %1802 }
 0x47a   : > { %v1806_v5 = vpop.xlane.xlu1 %1805 }
 0x47e   : > { %v1809_v37 = vpop.xlane.xlu1 %1808 }
 0x482   : > { %v1812_v29 = vpop.xlane.xlu1 %1811 }
 0x483   : > { %2503 = vrcp.f32 %v1812_v29 }
 0x484   : > { %2505 = vrcp.f32 %v1809_v37 }
 0x485   : > { %2507 = vrcp.f32 %v1806_v5 }
 0x486   : > { %v1183_v19 = vpop.permute.xlu1 %1182  ;;  %2509 = vrcp.f32 %v1803_v18 }
 0x487   : > { %v1204_v51 = vsel %vm362_vm7, %v1201_v28, %v1183_v19  ;;  %2511 = vrcp.f32 %v1800_v32 }
 0x488   : > { %2290 = vmatmul.mubr.msk.f32.vlgmr.msra.gmra.mxu0 %vm519_vm9, %v1204_v51  ;;  %2513 = vrcp.f32 %v1797_v56 }
 0x489   : > { %2329 = vmatprep.mubr.msk.f32.mxu0 %vm2596_vm1, %v2579_v0  ;;  %2515 = vrcp.f32 %v1794_v54  ;;  %vm1079_vm1 = vcmask 113720  }
 0x48a   : > { %v1575_v57 = vpop.permute.xlu1 %1574 }
 0x490   : > { %v2504_v7 = vpop.eup %2503 }
 0x491   : > { %v1826_v48 = vmul.f32 %v2504_v7, %v3221_v4  ;;  %v2506_v31 = vpop.eup %2505 }
 0x492   : > { %v1825_v58 = vmul.f32 %v2506_v31, %v3213_v27  ;;  %v2508_v14 = vpop.eup %2507 }
 0x493   : > { %2316 = vmatpush3.xpose.msk.msra.mxu0 %vm519_vm9, %v1826_v48  ;;  %v1824_v41 = vmul.f32 %v2508_v14, %v3209_v17  ;;  %v2510_v36 = vpop.eup %2509 }
 0x494   : > { %2317 = vmatprep.subr.mxu0 %v2579_v0  ;;  %v1823_v4 = vmul.f32 %v2510_v36, %v3205_v11  ;;  %v2512_v50 = vpop.eup %2511 }
 0x495   : > { %v1822_v27 = vmul.f32 %v2512_v50, %v3201_v35  ;;  %v2514_v3 = vpop.eup %2513  ;;  %v1593_v35 = vsel %vm358_vm6, %v3293_v2, %v1183_v19  ;;  %vm1104_vm6 = vcmask 687720  }
 0x496   : > { %v1821_v17 = vmul.f32 %v2514_v3, %v3195_v26  ;;  %v2516_v53 = vpop.eup %2515  ;;  %v1596_v47 = vsel %vm362_vm7, %v1593_v35, %v1575_v57  ;;  %vm1109_vm7 = vcmask 802520  }
 0x497   : > { %2318 = vmatpush3.xpose.msk.msra.mxu0 %vm519_vm9, %v1825_v58  ;;  %v1820_v11 = vmul.f32 %v2516_v53, %v3192_v22 }
 0x498   : > { %2319 = vmatprep.subr.mxu0 %v2579_v0 }
 0x49b   : > { %2320 = vmatpush3.xpose.msk.msra.mxu0 %vm519_vm9, %v1824_v41 }
 0x49c   : > { %2321 = vmatprep.subr.mxu0 %v2579_v0 }
 0x49f   : > { %2322 = vmatpush3.xpose.msk.msra.mxu0 %vm519_vm9, %v1823_v4 }
 0x4a0   : > { %2323 = vmatprep.subr.mxu0 %v2579_v0 }
 0x4a3   : > { %2324 = vmatpush3.xpose.msk.msra.mxu0 %vm519_vm9, %v1822_v27 }
 0x4a4   : > { %2325 = vmatprep.subr.mxu0 %v2579_v0 }
 0x4a7   : > { %2326 = vmatpush3.xpose.msk.msra.mxu0 %vm519_vm9, %v1821_v17 }
 0x4a8   : > { %2327 = vmatprep.subr.mxu0 %v2579_v0 }
 0x4ab   : > { %2328 = vmatpush3.xpose.msk.msra.mxu0 %vm519_vm9, %v1820_v11 }
 0x4ae   : > { %2330 = vmatmul.mubr.msk.f32.vlgmr.msra.gmra.mxu0 %vm519_vm9, %v1596_v47  ;;  %vm1545_vm9 = vcmask 39936  }
 0x4cf   : > { %v688_v26 = vpop.f32.mrf.mxu0 }
 0x4d0   : > { %709 = vrot.lane.b32.xlu0 %v688_v26, %s2597_s17  ;;  %694 = vrot.lane.b32.xlu1 %v688_v26, %s2598_s19  ;;  %692 = vst.msk [vmem:[%s3351_s20] sm:$0xff] %vm342_vm2, %v688_v26  ;;  %vm1084_vm2 = vcmask 228520  }
 0x4d1   : > { %v2211_v0 = vpop.f32.mrf.mxu0 }
 0x4d4   : > { %699 = vrot.lane.b32.xlu1 %v688_v26, %s2599_s24 }
 0x4d8   : > { %704 = vrot.lane.b32.xlu1 %v688_v26, %s2600_s25 }
 0x4dc   : > { %714 = vrot.lane.b32.xlu1 %v688_v26, %s2601_s26 }
 0x4e0   : > { %719 = vrot.lane.b32.xlu1 %v688_v26, %s2602_s27 }
 0x4eb   : > { %v1071_v22 = vpop.f32.mrf.mxu0 }
 0x4ec   : > { %1091 = vrot.lane.b32.xlu0 %v1071_v22, %s2597_s17  ;;  %1076 = vrot.lane.b32.xlu1 %v1071_v22, %s2598_s19  ;;  %s1972_s17 = sshll.u32 %s3351_s20, 4  ;;  %s1973_s17 = int_to_ptr.vmem [resolvable:$true] %s1972_s17 }
 0x4ed   : > { %v2251_v30 = vpop.f32.mrf.mxu0 }
 0x4f0   : > { %1096 = vrot.lane.b32.xlu0 %v1071_v22, %s2601_s26  ;;  %1081 = vrot.lane.b32.xlu1 %v1071_v22, %s2599_s24  ;;  %s1958_s26 = scalar_lea.sflag [#allocation3], %s161_s10 }
 0x4f4   : > { %1101 = vrot.lane.b32.xlu0 %v1071_v22, %s2602_s27  ;;  %1086 = vrot.lane.b32.xlu1 %v1071_v22, %s2600_s25  ;;  %s3395_s25 = scalar_lea.hbm %s3436_s3, %s2107_s11  ;;  %s2517_s27 = scalar_lea.vmem %s1973_s17, 256 }
 0x4f5   : > { %p2518_p11 = scmp.ne.s32.totalorder %s1973_s17, %s2517_s27 }
 0x4f7   : > { %p2519_p12 = pnand %p2518_p11, %p2671_p5 }
 0x4f8   : > { %1106 = vrot.lane.b32.xlu0 %v1071_v22, %s2603_s28  ;;  %s2521_s28 = sshll.u32 %s2612_s16, 4  ;;  %s2522_s28 = int_to_ptr.vmem [resolvable:$false] %s2521_s28 }
 0x4f9   : > { %p2520_p13 = pneg %p2519_p12  ;;  %p2524_p0 = scmp.lt.s32.totalorder %s1973_s17, %s2522_s28 }
 0x542   : > { %v695_v46 = vpop.permute.xlu1 %694  ;;  %v710_v9 = vpop.permute.xlu0 %709 }
 0x543   : > { %698 = vst.msk [vmem:[%s3351_s20] sm:$0xff] %vm697_vm11, %v695_v46  ;;  %vm1550_vm11 = vcmask 154720  }
 0x546   : > { %v700_v61 = vpop.permute.xlu1 %699 }
 0x547   : > { %703 = vst.msk [vmem:[%s3351_s20] sm:$0xff] %vm702_vm12, %v700_v61  ;;  %vm1543_vm12 = vcmask 1048560  }
 0x548   : > { %v1525_v20 = vpop.f32.mrf.mxu0 }
 0x549   : > { %1530 = vrot.lane.b32.xlu0 %v1525_v20, %s2604_s29  ;;  %1540 = vrot.lane.b32.xlu1 %v1525_v20, %s2605_s30  ;;  %s2523_s29 = scalar_lea.vmem %s2522_s28, 512 }
 0x54a   : > { %v705_v45 = vpop.permute.xlu1 %704  ;;  %v2291_v33 = vpop.f32.mrf.mxu0  ;;  %p2525_p1 = scmp.lt.s32.totalorder %s2523_s29, %s2517_s27 }
 0x54b   : > { %708 = vst.msk [vmem:[%s3351_s20] sm:$0xff] %vm707_vm13, %v705_v45  ;;  %vm1555_vm13 = vcmask 269520  }
 0x54c   : > { %713 = vst.msk [vmem:[%s3351_s20] sm:$0xff] %vm712_vm14, %v710_v9  ;;  %vm1560_vm14 = vcmask 384320   ;;  %p2526_p2 = por %p2525_p1, %p2524_p0 }
 0x54d   : > { %1535 = vrot.lane.b32.xlu0 %v1525_v20, %s2606_s4  ;;  %1547 = vrot.lane.b32.xlu1 %v1525_v20, %s2607_s5 }
 0x54e   : > { %v715_v52 = vpop.permute.xlu1 %714  ;;  %p2527_p3 = pnand %p2526_p2, %p2520_p13 }
 0x54f   : > { %718 = vst.msk [vmem:[%s3351_s20] sm:$0xff] %vm717_vm15, %v715_v52  ;;  %vm1565_vm15 = vcmask 499120  }
 0x551   : > { %1552 = vrot.lane.b32.xlu1 %v1525_v20, %s2608_s6 }
 0x552   : > { %v720_v55 = vpop.permute.xlu1 %719 }
 0x553   : > { %723 = vst.msk [vmem:[%s3351_s20] sm:$0xff] %vm722_vm0, %v720_v55  ;;  %vm1935_vm0 = vcmask 97320  }
 0x555   : > { %1557 = vrot.lane.b32.xlu1 %v1525_v20, %s2609_s8 }
 0x559   : > { %1562 = vrot.lane.b32.xlu1 %v1525_v20, %s2610_s9 }
 0x55e   : > { %v1092_v24 = vpop.permute.xlu0 %1091  ;;  %v1077_v59 = vpop.permute.xlu1 %1076 }
 0x55f   : > { %1080 = vst.msk [vmem:[%s3351_s20] sm:$0xff] %vm1079_vm1, %v1077_v59  ;;  %vm1940_vm1 = vcmask 212120  }
 0x562   : > { %v1097_v6 = vpop.permute.xlu0 %1096  ;;  %v1082_v40 = vpop.permute.xlu1 %1081 }
 0x563   : > { %1085 = vst.msk [vmem:[%s3351_s20] sm:$0xff] %vm1084_vm2, %v1082_v40  ;;  %vm1945_vm2 = vcmask 326920  }
 0x566   : > { %v1102_v62 = vpop.permute.xlu0 %1101  ;;  %v1087_v1 = vpop.permute.xlu1 %1086 }
 0x567   : > { %1090 = vst.msk [vmem:[%s3351_s20] sm:$0xff] %vm1089_vm3, %v1087_v1  ;;  %vm1950_vm3 = vcmask 441720  }
 0x568   : > { %1095 = vst.msk [vmem:[%s3351_s20] sm:$0xff] %vm1094_vm4, %v1092_v24  ;;  %vm1955_vm4 = vcmask 556520  }
 0x569   : > { %1100 = vst.msk [vmem:[%s3351_s20] sm:$0xff] %vm1099_vm5, %v1097_v6  ;;  %vm1925_vm5 = vcmask 917320  }
 0x56a   : > { %v1107_v15 = vpop.permute.xlu0 %1106  ;;  %1105 = vst.msk [vmem:[%s3351_s20] sm:$0xff] %vm1104_vm6, %v1102_v62  ;;  %vm1930_vm6 = vcmask 1032120  }
 0x56b   : > { %1110 = vst.msk [vmem:[%s3351_s20] sm:$0xff] %vm1109_vm7, %v1107_v15 }
 0x56e   : > { %v1917_v34 = vpop.f32.mrf.mxu0 }
 0x56f   : > { %1942 = vrot.lane.b32.xlu0 %v1917_v34, %s2609_s8  ;;  %1932 = vrot.lane.b32.xlu1 %v1917_v34, %s2607_s5 }
 0x570   : > { %v2331_v2 = vpop.f32.mrf.mxu0 }
 0x573   : > { %1947 = vrot.lane.b32.xlu0 %v1917_v34, %s2610_s9  ;;  %1937 = vrot.lane.b32.xlu1 %v1917_v34, %s2608_s6 }
 0x577   : > { %1952 = vrot.lane.b32.xlu0 %v1917_v34, %s2611_s7  ;;  %1922 = vrot.lane.b32.xlu1 %v1917_v34, %s2606_s4 }
 0x57b   : > { %1927 = vrot.lane.b32.xlu1 %v1917_v34, %s2605_s30 }
 0x5bb   : > { %v1531_v12 = vpop.permute.xlu0 %1530  ;;  %v1541_v13 = vpop.permute.xlu1 %1540 }
 0x5bc   : > { %1534 = vst.msk [vmem:[%s3351_s20] sm:$0xff] %vm1533_vm8, %v1531_v12 }
 0x5bd   : > { %1546 = vst.msk [vmem:[%s3351_s20 + $0x8] sm:$0xff] %vm1545_vm9, %v1541_v13 }
 0x5bf   : > { %v1536_v63 = vpop.permute.xlu0 %1535  ;;  %v1548_v60 = vpop.permute.xlu1 %1547 }
 0x5c0   : > { %1539 = vst.msk [vmem:[%s3351_s20] sm:$0xff] %vm1538_vm10, %v1536_v63 }
 0x5c1   : > { %1551 = vst.msk [vmem:[%s3351_s20 + $0x8] sm:$0xff] %vm1550_vm11, %v1548_v60 }
 0x5c2   : > { %1544 = vst.msk [vmem:[%s3351_s20] sm:$0xff] %vm1543_vm12, %v1541_v13 }
 0x5c3   : > { %v1553_v39 = vpop.permute.xlu1 %1552 }
 0x5c4   : > { %1556 = vst.msk [vmem:[%s3351_s20 + $0x8] sm:$0xff] %vm1555_vm13, %v1553_v39 }
 0x5c7   : > { %v1558_v25 = vpop.permute.xlu1 %1557 }
 0x5c8   : > { %1561 = vst.msk [vmem:[%s3351_s20 + $0x8] sm:$0xff] %vm1560_vm14, %v1558_v25 }
 0x5cb   : > { %v1563_v21 = vpop.permute.xlu1 %1562 }
 0x5cc   : > { %1566 = vst.msk [vmem:[%s3351_s20 + $0x8] sm:$0xff] %vm1565_vm15, %v1563_v21 }
 0x5e1   : > { %v1943_v49 = vpop.permute.xlu0 %1942  ;;  %v1933_v10 = vpop.permute.xlu1 %1932 }
 0x5e2   : > { %1936 = vst.msk [vmem:[%s3351_s20 + $0x8] sm:$0xff] %vm1935_vm0, %v1933_v10 }
 0x5e5   : > { %v1948_v42 = vpop.permute.xlu0 %1947  ;;  %v1938_v44 = vpop.permute.xlu1 %1937 }
 0x5e6   : > { %1941 = vst.msk [vmem:[%s3351_s20 + $0x8] sm:$0xff] %vm1940_vm1, %v1938_v44 }
 0x5e7   : > { %1946 = vst.msk [vmem:[%s3351_s20 + $0x8] sm:$0xff] %vm1945_vm2, %v1943_v49 }
 0x5e8   : > { %1951 = vst.msk [vmem:[%s3351_s20 + $0x8] sm:$0xff] %vm1950_vm3, %v1948_v42 }
 0x5e9   : > { %v1953_v43 = vpop.permute.xlu0 %1952  ;;  %v1923_v23 = vpop.permute.xlu1 %1922 }
 0x5ea   : > { %1956 = vst.msk [vmem:[%s3351_s20 + $0x8] sm:$0xff] %vm1955_vm4, %v1953_v43 }
 0x5eb   : > { %1926 = vst.msk [vmem:[%s3351_s20] sm:$0xff] %vm1925_vm5, %v1923_v23 }
 0x5ed   : > { %v1928_v38 = vpop.permute.xlu1 %1927 }
 0x5ee   : > { %1931 = vst.msk [vmem:[%s3351_s20] sm:$0xff] %vm1930_vm6, %v1928_v38 }
 0x5ef   : > { %2530 = shalt.err (!%p2527_p3)
}
 0x5f0   : > { %s2531_s20 = scalar_lea.hbm %s3395_s25, 256  ;;  %s2535_s4 = scalar_lea.hbm %s3436_s3, 512 }
 0x5f1   : > { %p2532_p4 = scmp.ne.s32.totalorder %s3395_s25, %s2531_s20  ;;  %p2536_p9 = scmp.lt.s32.totalorder %s3395_s25, %s3436_s3 }
 0x5f2   : > { %p2537_p10 = scmp.lt.s32.totalorder %s2535_s4, %s2531_s20 }
 0x5f3   : > { %p2533_p7 = pnand %p2532_p4, %p2671_p5 }
 0x5f4   : > { %p2538_p11 = por %p2537_p10, %p2536_p9 }
 0x5f5   : > { %p2534_p8 = pneg %p2533_p7 }
 0x5f7   : > { %p2539_p12 = pnand %p2538_p11, %p2534_p8 }
 0x5f9   : > { %2542 = shalt.err (!%p2539_p12)
}
 0x5fa   : > { %2332 = dma.vmem_to_hbm [thread:$0]  (%p2671_p5), %s1973_s17, 256, %s3395_s25, %s1958_s26  }
 0x5fb PF: > { %p2338_p13 = scmp.ge.s32.totalorder %s2577_s15, 2  ;;  %s1984_s8 = sand.u32 1, %s2565_s12  }
 0x5fc   : > { %s1985_s9 = scalar_lea.sflag [#allocation3], %s1984_s8 }
 0x5fd   : > { %p2335_p0 = pnand %p2338_p13, %p2675_p6 }
 0x5ff   : > { %p2336_p1 = pneg %p2335_p0 }
 0x601   : > { %2560 = dma.done.wait (%p2336_p1), %s1985_s9, 256  }
 0x602   : > { %2562 = vsyncadd (%p2336_p1), %s1985_s9, 4294967040  ;;  %p13_p2 = scmp.ge.s32.totalorder %s2658_s18, 4   ;;  %s3439_s12 = smov %s2569_s13 }
 0x603   : > { %s3440_s13 = smov %s2573_s14  ;;  %s3441_s14 = smov %s2669_s21 }
 0x604   : > { %s3442_s15 = smov %s2658_s18  ;;  %15 = sbr.rel (!%p13_p2) target bundleno = 3 (0x3), region = 67 }
 0x609   :  { %1990 = vsyncpa [#allocation3], 1 }
 0x60a   :  { %1992 = vsyncpa [#allocation3 + $0x1], 1 }

</bundles_post_ra>
